<compile_context>
chip_gen: v7x
topology: tpu7x:2x2x1
jax: 0.10.0
libtpu: 0.0.40
codegen_flags: <defaults>
</compile_context>

<pallas_src>
import functools
import math

import jax
import jax.numpy as jnp
from jax import lax
from jax.experimental import pallas as pl
from jax.experimental.pallas import tpu as pltpu


# dot_general dims for y = x @ W.T with W stored (out_features, in_features)
# (PyTorch nn.Linear layout): contract the LAST dim of both operands — no XLU
# transpose on the MXU feed path.
_DN_CONTRACT_LAST = (((1,), (1,)), ((), ()))


def _fused_mha_kernel(q_ref, k_ref, v_ref,
                      wq_ref, wk_ref, wv_ref, wo_ref, b_ref,
                      *rest,
                      num_heads, tb, mxu_dtype, has_mask,
                      mask_heads, mask_batched, approx_recip):
    """TB batch elements per grid step: projections + attention + out-proj."""
    if has_mask:
        mask_ref, o_ref, q_s, k_s, v_s, ctx_s = rest
    else:
        o_ref, q_s, k_s, v_s, ctx_s = rest
        mask_ref = None

    _, Lq, H = q_ref.shape
    _, Lk, _ = k_ref.shape
    d_key = H // num_heads
    scale = 1.0 / math.sqrt(d_key)

    # ---- fused-batch input projections on the flattened (TB*L, H) slab ----
    xq = q_ref[...].reshape(tb * Lq, H).astype(mxu_dtype)
    xk = k_ref[...].reshape(tb * Lk, H).astype(mxu_dtype)
    xv = v_ref[...].reshape(tb * Lk, H).astype(mxu_dtype)

    def proj(x, w_r, bias_row):
        # y = x @ W.T + b ; weights already mxu_dtype (pre-cast in wrapper),
        # f32 accumulation, f32 bias add.
        y = lax.dot_general(x, w_r[...], _DN_CONTRACT_LAST,
                            preferred_element_type=jnp.float32)
        return y + b_ref[bias_row:bias_row + 1, :]

    # Fold 1/sqrt(d_key) into q (TB*Lq x H, not Lq x Lk).
    q_s[...] = (proj(xq, wq_ref, 0) * scale).astype(mxu_dtype)
    k_s[...] = proj(xk, wk_ref, 1).astype(mxu_dtype)
    v_s[...] = proj(xv, wv_ref, 2).astype(mxu_dtype)

    # ---- attention: static (TB x nH) loop; per-iteration values are small
    # and dataflow goes through the scratch slabs, so live ranges stay bounded.
    for t in range(tb):
        rq = slice(t * Lq, (t + 1) * Lq)
        rk = slice(t * Lk, (t + 1) * Lk)
        for h in range(num_heads):
            c = slice(h * d_key, (h + 1) * d_key)
            qh = q_s[rq, c]                              # (Lq, Dk) mxu_dtype
            kh = k_s[rk, c]                              # (Lk, Dk)
            vh = v_s[rk, c]                              # (Lk, Dk)

            # scores = (q*scale) @ k.T  (contract Dk, last dim of both)
            s = lax.dot_general(qh, kh, _DN_CONTRACT_LAST,
                                preferred_element_type=jnp.float32)  # (Lq,Lk)

            if has_mask:
                mb = t if mask_batched else 0
                mh = h if mask_heads > 1 else 0
                keep = mask_ref[mb, mh] != 0             # (Lq, Lk) bool
                # Large finite negative (NaN-safe for fully-masked rows).
                s = jnp.where(keep, s, -1e30)

            # Numerically stable softmax in f32; normalize AFTER the PV
            # matmul so the reciprocal-multiply is (Lq, Dk), not (Lq, Lk).
            m = jnp.max(s, axis=-1, keepdims=True)
            e = jnp.exp(s - m)
            denom = jnp.sum(e, axis=-1, keepdims=True)
            ctx = jnp.dot(e.astype(mxu_dtype), vh,
                          preferred_element_type=jnp.float32)        # (Lq,Dk)
            ctx = ctx * pl.reciprocal(denom, approx=approx_recip)

            # Head "concat" is just a static column write into the slab.
            ctx_s[rq, c] = ctx.astype(mxu_dtype)

    # ---- single full-H-contraction output projection + bias, lane-dense store
    out = lax.dot_general(ctx_s[...], wo_ref[...], _DN_CONTRACT_LAST,
                          preferred_element_type=jnp.float32)        # (TB*Lq,H)
    out = out + b_ref[3:4, :]
    o_ref[...] = out.reshape(tb, Lq, H).astype(o_ref.dtype)


def _pick_batch_tile(B, Lq, Lk, H):
    """Pack batch elements per step while keeping the activation slab modest."""
    best = 1
    for tb in range(1, B + 1):
        if B % tb:
            continue
        rows = tb * max(Lq, Lk)
        act_bytes = tb * (2 * Lq + 2 * Lk) * H * 4
        if rows <= 512 and act_bytes <= (4 << 20):
            best = tb
    return best


def _vmem_limit_bytes(tb, Lq, Lk, H, mxu_dtype, mask_block_bytes):
    it = jnp.dtype(mxu_dtype).itemsize
    act_in = tb * (Lq + 2 * Lk) * H * 4
    act_out = tb * Lq * H * 4
    weights = 4 * H * H * it + 4 * H * 4
    scratch = (2 * tb * Lq + 2 * tb * Lk) * H * it
    est = 2 * (act_in + act_out + weights + mask_block_bytes) + scratch
    return int(min(64 << 20, max(32 << 20, 2 * est)))


def multihead_attention(params, q, k, v, num_attention_heads, mask=None,
                        mxu_dtype=jnp.bfloat16, batch_tile=None):
    """Fused MultiheadAttention forward (eval mode).

    q: (B, Lq, H); k, v: (B, Lk, H); mask (optional): 4-D, broadcastable to
    (B, nH, Lq, Lk), True/nonzero = attend (PyTorch semantics).
    Weights are PyTorch nn.Linear layout (H_out, H_in).
    mxu_dtype=bfloat16 is recommended on v5e, v6e and v7x (MXU is bf16-native
    on all three); softmax math stays in f32 regardless.
    """
    B, Lq, H = q.shape
    _, Lk, _ = k.shape
    nH = num_attention_heads
    assert H % nH == 0
    assert k.shape == v.shape

    tb = batch_tile or _pick_batch_tile(B, Lq, Lk, H)
    assert B % tb == 0

    wq, bq = params["w_q"]
    wk, bk = params["w_k"]
    wv, bv = params["w_v"]
    wo, bo = params["w_concat"]
    # Pre-cast weights once in the wrapper (halves weight HBM/VMEM bytes on
    # the bf16 path, removes per-grid-step VPU casts). Biases stay f32.
    wq_c, wk_c, wv_c, wo_c = (w.astype(mxu_dtype) for w in (wq, wk, wv, wo))
    biases = jnp.stack([bq, bk, bv, bo], axis=0).astype(jnp.float32)  # (4, H)

    q_spec = pl.BlockSpec((tb, Lq, H), lambda b: (b, 0, 0))
    kv_spec = pl.BlockSpec((tb, Lk, H), lambda b: (b, 0, 0))
    w_spec = pl.BlockSpec((H, H), lambda b: (0, 0))
    b_spec = pl.BlockSpec((4, H), lambda b: (0, 0))

    in_specs = [q_spec, kv_spec, kv_spec, w_spec, w_spec, w_spec, w_spec, b_spec]
    args = [q, k, v, wq_c, wk_c, wv_c, wo_c, biases]

    has_mask = mask is not None
    mask_heads = 1
    mask_batched = False
    mask_block_bytes = 0
    if has_mask:
        mask = jnp.asarray(mask)
        if mask.ndim == 3:                       # (B, Lq, Lk) -> add head dim
            mask = mask[:, None]
        assert mask.ndim == 4
        mb_dim, mh_dim = mask.shape[0], mask.shape[1]
        assert mb_dim in (1, B) and mh_dim in (1, nH)
        # Broadcast only the (Lq, Lk) dims; keep batch/head dims unbroadcast
        # (no nH-times mask bytes in HBM / VMEM).
        mask_i8 = jnp.broadcast_to(
            mask != 0, (mb_dim, mh_dim, Lq, Lk)).astype(jnp.int8)
        mask_heads = mh_dim
        mask_batched = (mb_dim == B)
        mask_tb = tb if mask_batched else 1
        mask_block_bytes = mask_tb * mh_dim * Lq * Lk
        if mask_batched:
            mask_spec = pl.BlockSpec((mask_tb, mh_dim, Lq, Lk),
                                     lambda b: (b, 0, 0, 0))
        else:
            mask_spec = pl.BlockSpec((mask_tb, mh_dim, Lq, Lk),
                                     lambda b: (0, 0, 0, 0))
        in_specs.append(mask_spec)
        args.append(mask_i8)

    # Exact reciprocal for the f32-exactness path; EUP approx on bf16 path.
    approx_recip = (jnp.dtype(mxu_dtype) != jnp.dtype(jnp.float32))

    kernel = functools.partial(
        _fused_mha_kernel,
        num_heads=nH, tb=tb, mxu_dtype=mxu_dtype, has_mask=has_mask,
        mask_heads=mask_heads, mask_batched=mask_batched,
        approx_recip=approx_recip)

    scratch_shapes = [
        pltpu.VMEM((tb * Lq, H), mxu_dtype),   # q projection (scaled)
        pltpu.VMEM((tb * Lk, H), mxu_dtype),   # k projection
        pltpu.VMEM((tb * Lk, H), mxu_dtype),   # v projection
        pltpu.VMEM((tb * Lq, H), mxu_dtype),   # context "concat" slab
    ]

    return pl.pallas_call(
        kernel,
        out_shape=jax.ShapeDtypeStruct((B, Lq, H), jnp.float32),
        grid=(B // tb,),
        in_specs=in_specs,
        out_specs=pl.BlockSpec((tb, Lq, H), lambda b: (b, 0, 0)),
        scratch_shapes=scratch_shapes,
        compiler_params=pltpu.CompilerParams(
            dimension_semantics=("parallel",),
            vmem_limit_bytes=_vmem_limit_bytes(
                tb, Lq, Lk, H, mxu_dtype, mask_block_bytes)),
    )(*args)


# ------------------------------ param init --------------------------------- #
def init_params(key, hidden_size):
    """Deterministic nn.Linear-style init (uniform +/- 1/sqrt(fan_in))."""
    bound = 1.0 / math.sqrt(hidden_size)
    keys = jax.random.split(key, 8)

    def lin(kw, kb):
        w = jax.random.uniform(kw, (hidden_size, hidden_size),
                               jnp.float32, -bound, bound)
        b = jax.random.uniform(kb, (hidden_size,), jnp.float32, -bound, bound)
        return w, b

    return {
        "w_q": lin(keys[0], keys[1]),
        "w_k": lin(keys[2], keys[3]),
        "w_v": lin(keys[4], keys[5]),
        "w_concat": lin(keys[6], keys[7]),
    }


# --------------------------------- main ------------------------------------ #
if __name__ == "__main__":
    B, L, H, NH = 2, 8, 32, 4
    dropout_p = 0.1  # identity in eval mode

    key = jax.random.PRNGKey(0)
    kp_params, kq, kk, kv = jax.random.split(key, 4)

    params = init_params(kp_params, H)
    q = jax.random.normal(kq, (B, L, H), jnp.float32)
    k = jax.random.normal(kk, (B, L, H), jnp.float32)
    v = jax.random.normal(kv, (B, L, H), jnp.float32)

    # pure-JAX reference (matches the PyTorch module semantics, eval mode)
    def ref(params, q, k, v, mask=None):
        def lin(x, wb):
            w, b = wb
            return x @ w.T + b

        qp, kp, vp = lin(q, params["w_q"]), lin(k, params["w_k"]), lin(v, params["w_v"])

        def split(t):
            return t.reshape(B, L, NH, H // NH).transpose(0, 2, 1, 3)

        qh, kh, vh = split(qp), split(kp), split(vp)
        scores = jnp.einsum("bhqd,bhkd->bhqk", qh, kh) / math.sqrt(H // NH)
        if mask is not None:
            scores = jnp.where(mask, scores, -jnp.inf)
        attn = jax.nn.softmax(scores, axis=-1)
        o = jnp.einsum("bhqk,bhkd->bhqd", attn, vh)
        o = o.transpose(0, 2, 1, 3).reshape(B, L, H)
        return lin(o, params["w_concat"])

    # 1) no-mask path, f32 MXU operands + exact reciprocal (tight check)
    out_f32 = multihead_attention(params, q, k, v, NH, mask=None,
                                  mxu_dtype=jnp.float32)
    jax.block_until_ready(out_f32)
    exp = ref(params, q, k, v)
    assert jnp.allclose(out_f32, exp, atol=2e-3, rtol=2e-3), \
        "f32 path mismatch vs reference"

    # 2) causal-mask path, bf16 MXU operands (perf-recommended on all gens)
    causal = jnp.tril(jnp.ones((L, L), jnp.bool_))[None, None]      # (1,1,L,L)
    out_bf16 = multihead_attention(params, q, k, v, NH, mask=causal,
                                   mxu_dtype=jnp.bfloat16)
    jax.block_until_ready(out_bf16)
    exp_m = ref(params, q, k, v, mask=jnp.broadcast_to(causal, (B, NH, L, L)))
    assert jnp.allclose(out_bf16, exp_m, atol=1e-1, rtol=1e-1), \
        "bf16 masked path mismatch vs reference"

    print("KERNEL_OK")
</pallas_src>

<mosaic_0001>
module attributes {stable_mosaic.version = 11 : i64} {
  func.func @_fused_mha_kernel(%arg0: i32, %arg1: memref<2x8x32xf32, #tpu.memory_space<vmem>>, %arg2: memref<2x8x32xf32, #tpu.memory_space<vmem>>, %arg3: memref<2x8x32xf32, #tpu.memory_space<vmem>>, %arg4: memref<32x32xf32, #tpu.memory_space<vmem>>, %arg5: memref<32x32xf32, #tpu.memory_space<vmem>>, %arg6: memref<32x32xf32, #tpu.memory_space<vmem>>, %arg7: memref<32x32xf32, #tpu.memory_space<vmem>>, %arg8: memref<4x32xf32, #tpu.memory_space<vmem>>, %arg9: memref<2x8x32xf32, #tpu.memory_space<vmem>>, %arg10: memref<16x32xf32, #tpu.memory_space<vmem>>, %arg11: memref<16x32xf32, #tpu.memory_space<vmem>>, %arg12: memref<16x32xf32, #tpu.memory_space<vmem>>, %arg13: memref<16x32xf32, #tpu.memory_space<vmem>>) attributes {dimension_semantics = [#tpu.dimension_semantics<parallel>], iteration_bounds = array<i64: 1>, scalar_prefetch = 0 : i64, scratch_operands = 4 : i64, tpu.core_type = #tpu.core_type<tc>, window_params = [{transform_indices = @transform_0, window_bounds = array<i64: 2, 8, 32>}, {transform_indices = @transform_1, window_bounds = array<i64: 2, 8, 32>}, {transform_indices = @transform_2, window_bounds = array<i64: 2, 8, 32>}, {pipeline_mode = #tpu.pipeline_mode<synchronous>, transform_indices = @transform_3, window_bounds = array<i64: 32, 32>}, {pipeline_mode = #tpu.pipeline_mode<synchronous>, transform_indices = @transform_4, window_bounds = array<i64: 32, 32>}, {pipeline_mode = #tpu.pipeline_mode<synchronous>, transform_indices = @transform_5, window_bounds = array<i64: 32, 32>}, {pipeline_mode = #tpu.pipeline_mode<synchronous>, transform_indices = @transform_6, window_bounds = array<i64: 32, 32>}, {pipeline_mode = #tpu.pipeline_mode<synchronous>, transform_indices = @transform_7, window_bounds = array<i64: 4, 32>}, {transform_indices = @transform_8, window_bounds = array<i64: 2, 8, 32>}]} {
    %c0 = arith.constant 0 : index
    %c0_0 = arith.constant 0 : index
    %c0_1 = arith.constant 0 : index
    %0 = vector.load %arg1[%c0, %c0_0, %c0_1] : memref<2x8x32xf32, #tpu.memory_space<vmem>>, vector<2x8x32xf32>
    %1 = vector.shape_cast %0 : vector<2x8x32xf32> to vector<16x32xf32>
    %c0_2 = arith.constant 0 : index
    %c0_3 = arith.constant 0 : index
    %c0_4 = arith.constant 0 : index
    %2 = vector.load %arg2[%c0_2, %c0_3, %c0_4] : memref<2x8x32xf32, #tpu.memory_space<vmem>>, vector<2x8x32xf32>
    %3 = vector.shape_cast %2 : vector<2x8x32xf32> to vector<16x32xf32>
    %c0_5 = arith.constant 0 : index
    %c0_6 = arith.constant 0 : index
    %c0_7 = arith.constant 0 : index
    %4 = vector.load %arg3[%c0_5, %c0_6, %c0_7] : memref<2x8x32xf32, #tpu.memory_space<vmem>>, vector<2x8x32xf32>
    %5 = vector.shape_cast %4 : vector<2x8x32xf32> to vector<16x32xf32>
    %c0_8 = arith.constant 0 : index
    %c0_9 = arith.constant 0 : index
    %6 = vector.load %arg4[%c0_8, %c0_9] : memref<32x32xf32, #tpu.memory_space<vmem>>, vector<32x32xf32>
    %cst = arith.constant dense<0.000000e+00> : vector<16x32xf32>
    %7 = tpu.matmul %1, %6, %cst {dimension_numbers = #tpu.dot_dimension_numbers<[1], [1], [0], [0], [0, 0, 1, 0], [], []>} : vector<16x32xf32>, vector<32x32xf32>, vector<16x32xf32> -> vector<16x32xf32>
    %c0_10 = arith.constant 0 : index
    %c0_11 = arith.constant 0 : index
    %8 = vector.load %arg8[%c0_10, %c0_11] : memref<4x32xf32, #tpu.memory_space<vmem>>, vector<1x32xf32>
    %9 = vector.broadcast %8 : vector<1x32xf32> to vector<16x32xf32>
    %10 = arith.addf %7, %9 : vector<16x32xf32>
    %cst_12 = arith.constant 0.353553385 : f32
    %11 = vector.broadcast %cst_12 : f32 to vector<16x32xf32>
    %12 = arith.mulf %10, %11 : vector<16x32xf32>
    %c0_13 = arith.constant 0 : index
    %c0_14 = arith.constant 0 : index
    %13 = vector.load %arg10[%c0_13, %c0_14] : memref<16x32xf32, #tpu.memory_space<vmem>>, vector<16x32xf32>
    tpu.vector_store %arg10[%c0_13, %c0_14], %12 {strides = array<i32>} : memref<16x32xf32, #tpu.memory_space<vmem>>, vector<16x32xf32>,
    %c0_15 = arith.constant 0 : index
    %c0_16 = arith.constant 0 : index
    %14 = vector.load %arg5[%c0_15, %c0_16] : memref<32x32xf32, #tpu.memory_space<vmem>>, vector<32x32xf32>
    %cst_17 = arith.constant dense<0.000000e+00> : vector<16x32xf32>
    %15 = tpu.matmul %3, %14, %cst_17 {dimension_numbers = #tpu.dot_dimension_numbers<[1], [1], [0], [0], [0, 0, 1, 0], [], []>} : vector<16x32xf32>, vector<32x32xf32>, vector<16x32xf32> -> vector<16x32xf32>
    %c1 = arith.constant 1 : index
    %c0_18 = arith.constant 0 : index
    %16 = vector.load %arg8[%c1, %c0_18] : memref<4x32xf32, #tpu.memory_space<vmem>>, vector<1x32xf32>
    %17 = vector.broadcast %16 : vector<1x32xf32> to vector<16x32xf32>
    %18 = arith.addf %15, %17 : vector<16x32xf32>
    %c0_19 = arith.constant 0 : index
    %c0_20 = arith.constant 0 : index
    %19 = vector.load %arg11[%c0_19, %c0_20] : memref<16x32xf32, #tpu.memory_space<vmem>>, vector<16x32xf32>
    tpu.vector_store %arg11[%c0_19, %c0_20], %18 {strides = array<i32>} : memref<16x32xf32, #tpu.memory_space<vmem>>, vector<16x32xf32>,
    %c0_21 = arith.constant 0 : index
    %c0_22 = arith.constant 0 : index
    %20 = vector.load %arg6[%c0_21, %c0_22] : memref<32x32xf32, #tpu.memory_space<vmem>>, vector<32x32xf32>
    %cst_23 = arith.constant dense<0.000000e+00> : vector<16x32xf32>
    %21 = tpu.matmul %5, %20, %cst_23 {dimension_numbers = #tpu.dot_dimension_numbers<[1], [1], [0], [0], [0, 0, 1, 0], [], []>} : vector<16x32xf32>, vector<32x32xf32>, vector<16x32xf32> -> vector<16x32xf32>
    %c2 = arith.constant 2 : index
    %c0_24 = arith.constant 0 : index
    %22 = vector.load %arg8[%c2, %c0_24] : memref<4x32xf32, #tpu.memory_space<vmem>>, vector<1x32xf32>
    %23 = vector.broadcast %22 : vector<1x32xf32> to vector<16x32xf32>
    %24 = arith.addf %21, %23 : vector<16x32xf32>
    %c0_25 = arith.constant 0 : index
    %c0_26 = arith.constant 0 : index
    %25 = vector.load %arg12[%c0_25, %c0_26] : memref<16x32xf32, #tpu.memory_space<vmem>>, vector<16x32xf32>
    tpu.vector_store %arg12[%c0_25, %c0_26], %24 {strides = array<i32>} : memref<16x32xf32, #tpu.memory_space<vmem>>, vector<16x32xf32>,
    %c0_27 = arith.constant 0 : index
    %c0_28 = arith.constant 0 : index
    %26 = vector.load %arg10[%c0_27, %c0_28] : memref<16x32xf32, #tpu.memory_space<vmem>>, vector<8x8xf32>
    %c0_29 = arith.constant 0 : index
    %c0_30 = arith.constant 0 : index
    %27 = vector.load %arg11[%c0_29, %c0_30] : memref<16x32xf32, #tpu.memory_space<vmem>>, vector<8x8xf32>
    %c0_31 = arith.constant 0 : index
    %c0_32 = arith.constant 0 : index
    %28 = vector.load %arg12[%c0_31, %c0_32] : memref<16x32xf32, #tpu.memory_space<vmem>>, vector<8x8xf32>
    %cst_33 = arith.constant dense<0.000000e+00> : vector<8x8xf32>
    %29 = tpu.matmul %26, %27, %cst_33 {dimension_numbers = #tpu.dot_dimension_numbers<[1], [1], [0], [0], [0, 0, 1, 0], [], []>} : vector<8x8xf32>, vector<8x8xf32>, vector<8x8xf32> -> vector<8x8xf32>
    %cst_34 = arith.constant dense<0xFF800000> : vector<8xf32>
    %30 = vector.multi_reduction <maximumf>, %29, %cst_34 [1] : vector<8x8xf32> to vector<8xf32>
    %31 = vector.shape_cast %30 : vector<8xf32> to vector<8x1xf32>
    %32 = vector.broadcast %31 : vector<8x1xf32> to vector<8x8xf32>
    %33 = arith.subf %29, %32 : vector<8x8xf32>
    %34 = math.exp %33 : vector<8x8xf32>
    %cst_35 = arith.constant dense<0.000000e+00> : vector<8xf32>
    %35 = vector.multi_reduction <add>, %34, %cst_35 [1] : vector<8x8xf32> to vector<8xf32>
    %36 = vector.shape_cast %35 : vector<8xf32> to vector<8x1xf32>
    %cst_36 = arith.constant dense<0.000000e+00> : vector<8x8xf32>
    %37 = tpu.matmul %34, %28, %cst_36 {dimension_numbers = #tpu.dot_dimension_numbers<[1], [0], [0], [1], [0, 0, 1, 1], [], []>} : vector<8x8xf32>, vector<8x8xf32>, vector<8x8xf32> -> vector<8x8xf32>
    %38 = tpu.reciprocal %36 : vector<8x1xf32> -> vector<8x1xf32>
    %39 = vector.broadcast %38 : vector<8x1xf32> to vector<8x8xf32>
    %40 = arith.mulf %37, %39 : vector<8x8xf32>
    %c0_37 = arith.constant 0 : index
    %c0_38 = arith.constant 0 : index
    %41 = vector.load %arg13[%c0_37, %c0_38] : memref<16x32xf32, #tpu.memory_space<vmem>>, vector<8x8xf32>
    tpu.vector_store %arg13[%c0_37, %c0_38], %40 {strides = array<i32>} : memref<16x32xf32, #tpu.memory_space<vmem>>, vector<8x8xf32>,
    %c0_39 = arith.constant 0 : index
    %c8 = arith.constant 8 : index
    %42 = vector.load %arg10[%c0_39, %c8] : memref<16x32xf32, #tpu.memory_space<vmem>>, vector<8x8xf32>
    %c0_40 = arith.constant 0 : index
    %c8_41 = arith.constant 8 : index
    %43 = vector.load %arg11[%c0_40, %c8_41] : memref<16x32xf32, #tpu.memory_space<vmem>>, vector<8x8xf32>
    %c0_42 = arith.constant 0 : index
    %c8_43 = arith.constant 8 : index
    %44 = vector.load %arg12[%c0_42, %c8_43] : memref<16x32xf32, #tpu.memory_space<vmem>>, vector<8x8xf32>
    %cst_44 = arith.constant dense<0.000000e+00> : vector<8x8xf32>
    %45 = tpu.matmul %42, %43, %cst_44 {dimension_numbers = #tpu.dot_dimension_numbers<[1], [1], [0], [0], [0, 0, 1, 0], [], []>} : vector<8x8xf32>, vector<8x8xf32>, vector<8x8xf32> -> vector<8x8xf32>
    %cst_45 = arith.constant dense<0xFF800000> : vector<8xf32>
    %46 = vector.multi_reduction <maximumf>, %45, %cst_45 [1] : vector<8x8xf32> to vector<8xf32>
    %47 = vector.shape_cast %46 : vector<8xf32> to vector<8x1xf32>
    %48 = vector.broadcast %47 : vector<8x1xf32> to vector<8x8xf32>
    %49 = arith.subf %45, %48 : vector<8x8xf32>
    %50 = math.exp %49 : vector<8x8xf32>
    %cst_46 = arith.constant dense<0.000000e+00> : vector<8xf32>
    %51 = vector.multi_reduction <add>, %50, %cst_46 [1] : vector<8x8xf32> to vector<8xf32>
    %52 = vector.shape_cast %51 : vector<8xf32> to vector<8x1xf32>
    %cst_47 = arith.constant dense<0.000000e+00> : vector<8x8xf32>
    %53 = tpu.matmul %50, %44, %cst_47 {dimension_numbers = #tpu.dot_dimension_numbers<[1], [0], [0], [1], [0, 0, 1, 1], [], []>} : vector<8x8xf32>, vector<8x8xf32>, vector<8x8xf32> -> vector<8x8xf32>
    %54 = tpu.reciprocal %52 : vector<8x1xf32> -> vector<8x1xf32>
    %55 = vector.broadcast %54 : vector<8x1xf32> to vector<8x8xf32>
    %56 = arith.mulf %53, %55 : vector<8x8xf32>
    %c0_48 = arith.constant 0 : index
    %c8_49 = arith.constant 8 : index
    %57 = vector.load %arg13[%c0_48, %c8_49] : memref<16x32xf32, #tpu.memory_space<vmem>>, vector<8x8xf32>
    tpu.vector_store %arg13[%c0_48, %c8_49], %56 {strides = array<i32>} : memref<16x32xf32, #tpu.memory_space<vmem>>, vector<8x8xf32>,
    %c0_50 = arith.constant 0 : index
    %c16 = arith.constant 16 : index
    %58 = vector.load %arg10[%c0_50, %c16] : memref<16x32xf32, #tpu.memory_space<vmem>>, vector<8x8xf32>
    %c0_51 = arith.constant 0 : index
    %c16_52 = arith.constant 16 : index
    %59 = vector.load %arg11[%c0_51, %c16_52] : memref<16x32xf32, #tpu.memory_space<vmem>>, vector<8x8xf32>
    %c0_53 = arith.constant 0 : index
    %c16_54 = arith.constant 16 : index
    %60 = vector.load %arg12[%c0_53, %c16_54] : memref<16x32xf32, #tpu.memory_space<vmem>>, vector<8x8xf32>
    %cst_55 = arith.constant dense<0.000000e+00> : vector<8x8xf32>
    %61 = tpu.matmul %58, %59, %cst_55 {dimension_numbers = #tpu.dot_dimension_numbers<[1], [1], [0], [0], [0, 0, 1, 0], [], []>} : vector<8x8xf32>, vector<8x8xf32>, vector<8x8xf32> -> vector<8x8xf32>
    %cst_56 = arith.constant dense<0xFF800000> : vector<8xf32>
    %62 = vector.multi_reduction <maximumf>, %61, %cst_56 [1] : vector<8x8xf32> to vector<8xf32>
    %63 = vector.shape_cast %62 : vector<8xf32> to vector<8x1xf32>
    %64 = vector.broadcast %63 : vector<8x1xf32> to vector<8x8xf32>
    %65 = arith.subf %61, %64 : vector<8x8xf32>
    %66 = math.exp %65 : vector<8x8xf32>
    %cst_57 = arith.constant dense<0.000000e+00> : vector<8xf32>
    %67 = vector.multi_reduction <add>, %66, %cst_57 [1] : vector<8x8xf32> to vector<8xf32>
    %68 = vector.shape_cast %67 : vector<8xf32> to vector<8x1xf32>
    %cst_58 = arith.constant dense<0.000000e+00> : vector<8x8xf32>
    %69 = tpu.matmul %66, %60, %cst_58 {dimension_numbers = #tpu.dot_dimension_numbers<[1], [0], [0], [1], [0, 0, 1, 1], [], []>} : vector<8x8xf32>, vector<8x8xf32>, vector<8x8xf32> -> vector<8x8xf32>
    %70 = tpu.reciprocal %68 : vector<8x1xf32> -> vector<8x1xf32>
    %71 = vector.broadcast %70 : vector<8x1xf32> to vector<8x8xf32>
    %72 = arith.mulf %69, %71 : vector<8x8xf32>
    %c0_59 = arith.constant 0 : index
    %c16_60 = arith.constant 16 : index
    %73 = vector.load %arg13[%c0_59, %c16_60] : memref<16x32xf32, #tpu.memory_space<vmem>>, vector<8x8xf32>
    tpu.vector_store %arg13[%c0_59, %c16_60], %72 {strides = array<i32>} : memref<16x32xf32, #tpu.memory_space<vmem>>, vector<8x8xf32>,
    %c0_61 = arith.constant 0 : index
    %c24 = arith.constant 24 : index
    %74 = vector.load %arg10[%c0_61, %c24] : memref<16x32xf32, #tpu.memory_space<vmem>>, vector<8x8xf32>
    %c0_62 = arith.constant 0 : index
    %c24_63 = arith.constant 24 : index
    %75 = vector.load %arg11[%c0_62, %c24_63] : memref<16x32xf32, #tpu.memory_space<vmem>>, vector<8x8xf32>
    %c0_64 = arith.constant 0 : index
    %c24_65 = arith.constant 24 : index
    %76 = vector.load %arg12[%c0_64, %c24_65] : memref<16x32xf32, #tpu.memory_space<vmem>>, vector<8x8xf32>
    %cst_66 = arith.constant dense<0.000000e+00> : vector<8x8xf32>
    %77 = tpu.matmul %74, %75, %cst_66 {dimension_numbers = #tpu.dot_dimension_numbers<[1], [1], [0], [0], [0, 0, 1, 0], [], []>} : vector<8x8xf32>, vector<8x8xf32>, vector<8x8xf32> -> vector<8x8xf32>
    %cst_67 = arith.constant dense<0xFF800000> : vector<8xf32>
    %78 = vector.multi_reduction <maximumf>, %77, %cst_67 [1] : vector<8x8xf32> to vector<8xf32>
    %79 = vector.shape_cast %78 : vector<8xf32> to vector<8x1xf32>
    %80 = vector.broadcast %79 : vector<8x1xf32> to vector<8x8xf32>
    %81 = arith.subf %77, %80 : vector<8x8xf32>
    %82 = math.exp %81 : vector<8x8xf32>
    %cst_68 = arith.constant dense<0.000000e+00> : vector<8xf32>
    %83 = vector.multi_reduction <add>, %82, %cst_68 [1] : vector<8x8xf32> to vector<8xf32>
    %84 = vector.shape_cast %83 : vector<8xf32> to vector<8x1xf32>
    %cst_69 = arith.constant dense<0.000000e+00> : vector<8x8xf32>
    %85 = tpu.matmul %82, %76, %cst_69 {dimension_numbers = #tpu.dot_dimension_numbers<[1], [0], [0], [1], [0, 0, 1, 1], [], []>} : vector<8x8xf32>, vector<8x8xf32>, vector<8x8xf32> -> vector<8x8xf32>
    %86 = tpu.reciprocal %84 : vector<8x1xf32> -> vector<8x1xf32>
    %87 = vector.broadcast %86 : vector<8x1xf32> to vector<8x8xf32>
    %88 = arith.mulf %85, %87 : vector<8x8xf32>
    %c0_70 = arith.constant 0 : index
    %c24_71 = arith.constant 24 : index
    %89 = vector.load %arg13[%c0_70, %c24_71] : memref<16x32xf32, #tpu.memory_space<vmem>>, vector<8x8xf32>
    tpu.vector_store %arg13[%c0_70, %c24_71], %88 {strides = array<i32>} : memref<16x32xf32, #tpu.memory_space<vmem>>, vector<8x8xf32>,
    %c8_72 = arith.constant 8 : index
    %c0_73 = arith.constant 0 : index
    %90 = vector.load %arg10[%c8_72, %c0_73] : memref<16x32xf32, #tpu.memory_space<vmem>>, vector<8x8xf32>
    %c8_74 = arith.constant 8 : index
    %c0_75 = arith.constant 0 : index
    %91 = vector.load %arg11[%c8_74, %c0_75] : memref<16x32xf32, #tpu.memory_space<vmem>>, vector<8x8xf32>
    %c8_76 = arith.constant 8 : index
    %c0_77 = arith.constant 0 : index
    %92 = vector.load %arg12[%c8_76, %c0_77] : memref<16x32xf32, #tpu.memory_space<vmem>>, vector<8x8xf32>
    %cst_78 = arith.constant dense<0.000000e+00> : vector<8x8xf32>
    %93 = tpu.matmul %90, %91, %cst_78 {dimension_numbers = #tpu.dot_dimension_numbers<[1], [1], [0], [0], [0, 0, 1, 0], [], []>} : vector<8x8xf32>, vector<8x8xf32>, vector<8x8xf32> -> vector<8x8xf32>
    %cst_79 = arith.constant dense<0xFF800000> : vector<8xf32>
    %94 = vector.multi_reduction <maximumf>, %93, %cst_79 [1] : vector<8x8xf32> to vector<8xf32>
    %95 = vector.shape_cast %94 : vector<8xf32> to vector<8x1xf32>
    %96 = vector.broadcast %95 : vector<8x1xf32> to vector<8x8xf32>
    %97 = arith.subf %93, %96 : vector<8x8xf32>
    %98 = math.exp %97 : vector<8x8xf32>
    %cst_80 = arith.constant dense<0.000000e+00> : vector<8xf32>
    %99 = vector.multi_reduction <add>, %98, %cst_80 [1] : vector<8x8xf32> to vector<8xf32>
    %100 = vector.shape_cast %99 : vector<8xf32> to vector<8x1xf32>
    %cst_81 = arith.constant dense<0.000000e+00> : vector<8x8xf32>
    %101 = tpu.matmul %98, %92, %cst_81 {dimension_numbers = #tpu.dot_dimension_numbers<[1], [0], [0], [1], [0, 0, 1, 1], [], []>} : vector<8x8xf32>, vector<8x8xf32>, vector<8x8xf32> -> vector<8x8xf32>
    %102 = tpu.reciprocal %100 : vector<8x1xf32> -> vector<8x1xf32>
    %103 = vector.broadcast %102 : vector<8x1xf32> to vector<8x8xf32>
    %104 = arith.mulf %101, %103 : vector<8x8xf32>
    %c8_82 = arith.constant 8 : index
    %c0_83 = arith.constant 0 : index
    %105 = vector.load %arg13[%c8_82, %c0_83] : memref<16x32xf32, #tpu.memory_space<vmem>>, vector<8x8xf32>
    tpu.vector_store %arg13[%c8_82, %c0_83], %104 {strides = array<i32>} : memref<16x32xf32, #tpu.memory_space<vmem>>, vector<8x8xf32>,
    %c8_84 = arith.constant 8 : index
    %c8_85 = arith.constant 8 : index
    %106 = vector.load %arg10[%c8_84, %c8_85] : memref<16x32xf32, #tpu.memory_space<vmem>>, vector<8x8xf32>
    %c8_86 = arith.constant 8 : index
    %c8_87 = arith.constant 8 : index
    %107 = vector.load %arg11[%c8_86, %c8_87] : memref<16x32xf32, #tpu.memory_space<vmem>>, vector<8x8xf32>
    %c8_88 = arith.constant 8 : index
    %c8_89 = arith.constant 8 : index
    %108 = vector.load %arg12[%c8_88, %c8_89] : memref<16x32xf32, #tpu.memory_space<vmem>>, vector<8x8xf32>
    %cst_90 = arith.constant dense<0.000000e+00> : vector<8x8xf32>
    %109 = tpu.matmul %106, %107, %cst_90 {dimension_numbers = #tpu.dot_dimension_numbers<[1], [1], [0], [0], [0, 0, 1, 0], [], []>} : vector<8x8xf32>, vector<8x8xf32>, vector<8x8xf32> -> vector<8x8xf32>
    %cst_91 = arith.constant dense<0xFF800000> : vector<8xf32>
    %110 = vector.multi_reduction <maximumf>, %109, %cst_91 [1] : vector<8x8xf32> to vector<8xf32>
    %111 = vector.shape_cast %110 : vector<8xf32> to vector<8x1xf32>
    %112 = vector.broadcast %111 : vector<8x1xf32> to vector<8x8xf32>
    %113 = arith.subf %109, %112 : vector<8x8xf32>
    %114 = math.exp %113 : vector<8x8xf32>
    %cst_92 = arith.constant dense<0.000000e+00> : vector<8xf32>
    %115 = vector.multi_reduction <add>, %114, %cst_92 [1] : vector<8x8xf32> to vector<8xf32>
    %116 = vector.shape_cast %115 : vector<8xf32> to vector<8x1xf32>
    %cst_93 = arith.constant dense<0.000000e+00> : vector<8x8xf32>
    %117 = tpu.matmul %114, %108, %cst_93 {dimension_numbers = #tpu.dot_dimension_numbers<[1], [0], [0], [1], [0, 0, 1, 1], [], []>} : vector<8x8xf32>, vector<8x8xf32>, vector<8x8xf32> -> vector<8x8xf32>
    %118 = tpu.reciprocal %116 : vector<8x1xf32> -> vector<8x1xf32>
    %119 = vector.broadcast %118 : vector<8x1xf32> to vector<8x8xf32>
    %120 = arith.mulf %117, %119 : vector<8x8xf32>
    %c8_94 = arith.constant 8 : index
    %c8_95 = arith.constant 8 : index
    %121 = vector.load %arg13[%c8_94, %c8_95] : memref<16x32xf32, #tpu.memory_space<vmem>>, vector<8x8xf32>
    tpu.vector_store %arg13[%c8_94, %c8_95], %120 {strides = array<i32>} : memref<16x32xf32, #tpu.memory_space<vmem>>, vector<8x8xf32>,
    %c8_96 = arith.constant 8 : index
    %c16_97 = arith.constant 16 : index
    %122 = vector.load %arg10[%c8_96, %c16_97] : memref<16x32xf32, #tpu.memory_space<vmem>>, vector<8x8xf32>
    %c8_98 = arith.constant 8 : index
    %c16_99 = arith.constant 16 : index
    %123 = vector.load %arg11[%c8_98, %c16_99] : memref<16x32xf32, #tpu.memory_space<vmem>>, vector<8x8xf32>
    %c8_100 = arith.constant 8 : index
    %c16_101 = arith.constant 16 : index
    %124 = vector.load %arg12[%c8_100, %c16_101] : memref<16x32xf32, #tpu.memory_space<vmem>>, vector<8x8xf32>
    %cst_102 = arith.constant dense<0.000000e+00> : vector<8x8xf32>
    %125 = tpu.matmul %122, %123, %cst_102 {dimension_numbers = #tpu.dot_dimension_numbers<[1], [1], [0], [0], [0, 0, 1, 0], [], []>} : vector<8x8xf32>, vector<8x8xf32>, vector<8x8xf32> -> vector<8x8xf32>
    %cst_103 = arith.constant dense<0xFF800000> : vector<8xf32>
    %126 = vector.multi_reduction <maximumf>, %125, %cst_103 [1] : vector<8x8xf32> to vector<8xf32>
    %127 = vector.shape_cast %126 : vector<8xf32> to vector<8x1xf32>
    %128 = vector.broadcast %127 : vector<8x1xf32> to vector<8x8xf32>
    %129 = arith.subf %125, %128 : vector<8x8xf32>
    %130 = math.exp %129 : vector<8x8xf32>
    %cst_104 = arith.constant dense<0.000000e+00> : vector<8xf32>
    %131 = vector.multi_reduction <add>, %130, %cst_104 [1] : vector<8x8xf32> to vector<8xf32>
    %132 = vector.shape_cast %131 : vector<8xf32> to vector<8x1xf32>
    %cst_105 = arith.constant dense<0.000000e+00> : vector<8x8xf32>
    %133 = tpu.matmul %130, %124, %cst_105 {dimension_numbers = #tpu.dot_dimension_numbers<[1], [0], [0], [1], [0, 0, 1, 1], [], []>} : vector<8x8xf32>, vector<8x8xf32>, vector<8x8xf32> -> vector<8x8xf32>
    %134 = tpu.reciprocal %132 : vector<8x1xf32> -> vector<8x1xf32>
    %135 = vector.broadcast %134 : vector<8x1xf32> to vector<8x8xf32>
    %136 = arith.mulf %133, %135 : vector<8x8xf32>
    %c8_106 = arith.constant 8 : index
    %c16_107 = arith.constant 16 : index
    %137 = vector.load %arg13[%c8_106, %c16_107] : memref<16x32xf32, #tpu.memory_space<vmem>>, vector<8x8xf32>
    tpu.vector_store %arg13[%c8_106, %c16_107], %136 {strides = array<i32>} : memref<16x32xf32, #tpu.memory_space<vmem>>, vector<8x8xf32>,
    %c8_108 = arith.constant 8 : index
    %c24_109 = arith.constant 24 : index
    %138 = vector.load %arg10[%c8_108, %c24_109] : memref<16x32xf32, #tpu.memory_space<vmem>>, vector<8x8xf32>
    %c8_110 = arith.constant 8 : index
    %c24_111 = arith.constant 24 : index
    %139 = vector.load %arg11[%c8_110, %c24_111] : memref<16x32xf32, #tpu.memory_space<vmem>>, vector<8x8xf32>
    %c8_112 = arith.constant 8 : index
    %c24_113 = arith.constant 24 : index
    %140 = vector.load %arg12[%c8_112, %c24_113] : memref<16x32xf32, #tpu.memory_space<vmem>>, vector<8x8xf32>
    %cst_114 = arith.constant dense<0.000000e+00> : vector<8x8xf32>
    %141 = tpu.matmul %138, %139, %cst_114 {dimension_numbers = #tpu.dot_dimension_numbers<[1], [1], [0], [0], [0, 0, 1, 0], [], []>} : vector<8x8xf32>, vector<8x8xf32>, vector<8x8xf32> -> vector<8x8xf32>
    %cst_115 = arith.constant dense<0xFF800000> : vector<8xf32>
    %142 = vector.multi_reduction <maximumf>, %141, %cst_115 [1] : vector<8x8xf32> to vector<8xf32>
    %143 = vector.shape_cast %142 : vector<8xf32> to vector<8x1xf32>
    %144 = vector.broadcast %143 : vector<8x1xf32> to vector<8x8xf32>
    %145 = arith.subf %141, %144 : vector<8x8xf32>
    %146 = math.exp %145 : vector<8x8xf32>
    %cst_116 = arith.constant dense<0.000000e+00> : vector<8xf32>
    %147 = vector.multi_reduction <add>, %146, %cst_116 [1] : vector<8x8xf32> to vector<8xf32>
    %148 = vector.shape_cast %147 : vector<8xf32> to vector<8x1xf32>
    %cst_117 = arith.constant dense<0.000000e+00> : vector<8x8xf32>
    %149 = tpu.matmul %146, %140, %cst_117 {dimension_numbers = #tpu.dot_dimension_numbers<[1], [0], [0], [1], [0, 0, 1, 1], [], []>} : vector<8x8xf32>, vector<8x8xf32>, vector<8x8xf32> -> vector<8x8xf32>
    %150 = tpu.reciprocal %148 : vector<8x1xf32> -> vector<8x1xf32>
    %151 = vector.broadcast %150 : vector<8x1xf32> to vector<8x8xf32>
    %152 = arith.mulf %149, %151 : vector<8x8xf32>
    %c8_118 = arith.constant 8 : index
    %c24_119 = arith.constant 24 : index
    %153 = vector.load %arg13[%c8_118, %c24_119] : memref<16x32xf32, #tpu.memory_space<vmem>>, vector<8x8xf32>
    tpu.vector_store %arg13[%c8_118, %c24_119], %152 {strides = array<i32>} : memref<16x32xf32, #tpu.memory_space<vmem>>, vector<8x8xf32>,
    %c0_120 = arith.constant 0 : index
    %c0_121 = arith.constant 0 : index
    %154 = vector.load %arg13[%c0_120, %c0_121] : memref<16x32xf32, #tpu.memory_space<vmem>>, vector<16x32xf32>
    %c0_122 = arith.constant 0 : index
    %c0_123 = arith.constant 0 : index
    %155 = vector.load %arg7[%c0_122, %c0_123] : memref<32x32xf32, #tpu.memory_space<vmem>>, vector<32x32xf32>
    %cst_124 = arith.constant dense<0.000000e+00> : vector<16x32xf32>
    %156 = tpu.matmul %154, %155, %cst_124 {dimension_numbers = #tpu.dot_dimension_numbers<[1], [1], [0], [0], [0, 0, 1, 0], [], []>} : vector<16x32xf32>, vector<32x32xf32>, vector<16x32xf32> -> vector<16x32xf32>
    %c3 = arith.constant 3 : index
    %c0_125 = arith.constant 0 : index
    %157 = vector.load %arg8[%c3, %c0_125] : memref<4x32xf32, #tpu.memory_space<vmem>>, vector<1x32xf32>
    %158 = vector.broadcast %157 : vector<1x32xf32> to vector<16x32xf32>
    %159 = arith.addf %156, %158 : vector<16x32xf32>
    %160 = vector.shape_cast %159 : vector<16x32xf32> to vector<2x8x32xf32>
    %c0_126 = arith.constant 0 : index
    %c0_127 = arith.constant 0 : index
    %c0_128 = arith.constant 0 : index
    %161 = vector.load %arg9[%c0_126, %c0_127, %c0_128] : memref<2x8x32xf32, #tpu.memory_space<vmem>>, vector<2x8x32xf32>
    tpu.vector_store %arg9[%c0_126, %c0_127, %c0_128], %160 {strides = array<i32>} : memref<2x8x32xf32, #tpu.memory_space<vmem>>, vector<2x8x32xf32>,
    return
  }
  func.func @transform_0(%arg0: i32) -> (i32, i32, i32) {
    %c0_i32 = arith.constant 0 : i32
    %c0_i32_0 = arith.constant 0 : i32
    %c0_i32_1 = arith.constant 0 : i32
    return %arg0, %c0_i32, %c0_i32_0 : i32, i32, i32
  }
  func.func @transform_1(%arg0: i32) -> (i32, i32, i32) {
    %c0_i32 = arith.constant 0 : i32
    %c0_i32_0 = arith.constant 0 : i32
    %c0_i32_1 = arith.constant 0 : i32
    return %arg0, %c0_i32, %c0_i32_0 : i32, i32, i32
  }
  func.func @transform_2(%arg0: i32) -> (i32, i32, i32) {
    %c0_i32 = arith.constant 0 : i32
    %c0_i32_0 = arith.constant 0 : i32
    %c0_i32_1 = arith.constant 0 : i32
    return %arg0, %c0_i32, %c0_i32_0 : i32, i32, i32
  }
  func.func @transform_3(%arg0: i32) -> (i32, i32) {
    %c0_i32 = arith.constant 0 : i32
    %c0_i32_0 = arith.constant 0 : i32
    %c0_i32_1 = arith.constant 0 : i32
    return %c0_i32, %c0_i32_0 : i32, i32
  }
  func.func @transform_4(%arg0: i32) -> (i32, i32) {
    %c0_i32 = arith.constant 0 : i32
    %c0_i32_0 = arith.constant 0 : i32
    %c0_i32_1 = arith.constant 0 : i32
    return %c0_i32, %c0_i32_0 : i32, i32
  }
  func.func @transform_5(%arg0: i32) -> (i32, i32) {
    %c0_i32 = arith.constant 0 : i32
    %c0_i32_0 = arith.constant 0 : i32
    %c0_i32_1 = arith.constant 0 : i32
    return %c0_i32, %c0_i32_0 : i32, i32
  }
  func.func @transform_6(%arg0: i32) -> (i32, i32) {
    %c0_i32 = arith.constant 0 : i32
    %c0_i32_0 = arith.constant 0 : i32
    %c0_i32_1 = arith.constant 0 : i32
    return %c0_i32, %c0_i32_0 : i32, i32
  }
  func.func @transform_7(%arg0: i32) -> (i32, i32) {
    %c0_i32 = arith.constant 0 : i32
    %c0_i32_0 = arith.constant 0 : i32
    %c0_i32_1 = arith.constant 0 : i32
    return %c0_i32, %c0_i32_0 : i32, i32
  }
  func.func @transform_8(%arg0: i32) -> (i32, i32, i32) {
    %c0_i32 = arith.constant 0 : i32
    %c0_i32_0 = arith.constant 0 : i32
    %c0_i32_1 = arith.constant 0 : i32
    return %arg0, %c0_i32, %c0_i32_0 : i32, i32, i32
  }
}

</mosaic_0001>

<bundles_post_ra>
// kernel: tpu_custom_call.1
= control target key start
LH: loop header
LB: loop body
LE: loop exit
PB: predicated region body
PF: predicated region fallthrough
CT: control target
= control target key end

     0   :  { %13 = vsyncpa [#allocation7], 0  ;;  %s2899_s0 = inlined_call_operand.hbm [shape: f32[2,8,32], index: 0, kind: input, shape index: {}]   ;;  %s2900_s1 = inlined_call_operand.hbm [shape: f32[2,8,32], index: 1, kind: input, shape index: {}]   ;;  %s2901_s2 = inlined_call_operand.hbm [shape: f32[2,8,32], index: 2, kind: input, shape index: {}]   ;;  %s2902_s3 = inlined_call_operand.hbm [shape: f32[32,32], index: 3, kind: input, shape index: {}]   ;;  %s2903_s4 = inlined_call_operand.hbm [shape: f32[32,32], index: 4, kind: input, shape index: {}]   ;;  %s2904_s5 = inlined_call_operand.hbm [shape: f32[32,32], index: 5, kind: input, shape index: {}]   ;;  %s2905_s6 = inlined_call_operand.hbm [shape: f32[32,32], index: 6, kind: input, shape index: {}]   ;;  %s2906_s7 = inlined_call_operand.vmem [shape: f32[4,32], index: 7, kind: input, shape index: {}]   ;;  %s2907_s8 = inlined_call_operand.hbm [shape: f32[2,8,32], index: 8, kind: output, shape index: {}]  }
   0x1   :  { %14 = vsyncpa [#allocation10], 0 }
   0x2   :  { %15 = vsyncpa [#allocation13], 0 }
   0x3   :  { %16 = vsyncpa [#allocation16], 0 }
   0x4   :  { %17 = vsyncpa [#allocation8], 0  ;;  %s2475_s27 = smov [#allocation9]   ;;  %s2476_s29 = smov [#allocation12]  }
   0x5   :  { %s35_s28 = sshll.u32 %s2475_s27, 4  ;;  %s59_s30 = sshll.u32 %s2476_s29, 4  ;;  %s36_s28 = int_to_ptr.vmem [resolvable:$true] %s35_s28  ;;  %s2537_s30 = int_to_ptr.vmem [resolvable:$true] %s59_s30 }
   0x6   :  { %s2289_s11 = scalar_lea.hbm %s2900_s1, 256 }
   0x7   :  { %p2290_p0 = scmp.ne.s32.totalorder %s2900_s1, %s2289_s11  ;;  %p2293_p1 = scmp.lt.u32.totalorder %s2289_s11, %s2900_s1 }
   0x9   :  { %p2295_p2 = pnand %p2293_p1, %p2290_p0 }
   0xb   :  { %2298 = shalt.err (!%p2295_p2)
}
   0xc   :  { %s2299_s16 = scalar_lea.vmem %s36_s28, 256  ;;  %p2304_p4 = scmp.lt.s32.totalorder %s36_s28, %s36_s28 }
   0xd   :  { %p2300_p3 = scmp.ne.s32.totalorder %s36_s28, %s2299_s16  ;;  %p2305_p5 = scmp.lt.s32.totalorder %s2299_s16, %s2299_s16 }
   0xf   :  { %p2306_p6 = por %p2305_p5, %p2304_p4 }
  0x11   :  { %p2307_p7 = pnand %p2306_p6, %p2300_p3 }
  0x13   :  { %2310 = shalt.err (!%p2307_p7)
}
  0x14   :  { %s2477_s17 = smov 128   ;;  %s2478_s18 = smov 8  }
  0x15   :  { %41 = dma.hbm_to_vmem [thread:$0]  %s2900_s1, 256, %s36_s28, [#allocation10], %s2477_s17, %s2477_s17, %s2478_s18  }
  0x16   :  { %s2311_s23 = scalar_lea.hbm %s2902_s3, 512 }
  0x17   :  { %p2312_p8 = scmp.ne.s32.totalorder %s2902_s3, %s2311_s23  ;;  %p2315_p9 = scmp.lt.u32.totalorder %s2311_s23, %s2902_s3 }
  0x19   :  { %p2317_p10 = pnand %p2315_p9, %p2312_p8 }
  0x1b   :  { %2320 = shalt.err (!%p2317_p10)
}
  0x1c   :  { %s2321_s29 = scalar_lea.vmem %s2537_s30, 512  ;;  %p2326_p12 = scmp.lt.s32.totalorder %s2537_s30, %s2537_s30 }
  0x1d   :  { %p2322_p11 = scmp.ne.s32.totalorder %s2537_s30, %s2321_s29  ;;  %p2327_p13 = scmp.lt.s32.totalorder %s2321_s29, %s2321_s29 }
  0x1f   :  { %p2328_p0 = por %p2327_p13, %p2326_p12 }
  0x21   :  { %p2329_p1 = pnand %p2328_p0, %p2322_p11 }
  0x23   :  { %2332 = shalt.err (!%p2329_p1)
}
  0x24   :  { %65 = dma.hbm_to_vmem [thread:$0]  %s2902_s3, 512, %s2537_s30, [#allocation13], %s2477_s17, %s2477_s17, %s2478_s18  }
  0x25   :  { %s2479_s9 = smov [#allocation15]   ;;  %s2480_s11 = smov [#allocation6]  }
  0x26   :  { %s83_s10 = sshll.u32 %s2479_s9, 4  ;;  %s23_s12 = sshll.u32 %s2480_s11, 4  ;;  %s84_s10 = int_to_ptr.vmem [resolvable:$true] %s83_s10  ;;  %s2574_s12 = int_to_ptr.vmem [resolvable:$true] %s23_s12 }
  0x27   :  { %s2333_s15 = scalar_lea.hbm %s2904_s5, 512 }
  0x28   :  { %p2334_p2 = scmp.ne.s32.totalorder %s2904_s5, %s2333_s15  ;;  %p2337_p3 = scmp.lt.u32.totalorder %s2333_s15, %s2904_s5 }
  0x2a   :  { %p2339_p4 = pnand %p2337_p3, %p2334_p2 }
  0x2c   :  { %2342 = shalt.err (!%p2339_p4)
}
  0x2d   :  { %s2343_s3 = scalar_lea.vmem %s84_s10, 512  ;;  %p2348_p6 = scmp.lt.s32.totalorder %s84_s10, %s84_s10 }
  0x2e   :  { %p2344_p5 = scmp.ne.s32.totalorder %s84_s10, %s2343_s3  ;;  %p2349_p7 = scmp.lt.s32.totalorder %s2343_s3, %s2343_s3 }
  0x30   :  { %p2350_p8 = por %p2349_p7, %p2348_p6 }
  0x32   :  { %p2351_p9 = pnand %p2350_p8, %p2344_p5 }
  0x34   :  { %2354 = shalt.err (!%p2351_p9)
}
  0x35   :  { %89 = dma.hbm_to_vmem [thread:$0]  %s2904_s5, 512, %s84_s10, [#allocation16], %s2477_s17, %s2477_s17, %s2478_s18  }
  0x36   :  { %s2355_s25 = scalar_lea.hbm %s2899_s0, 256 }
  0x37   :  { %p2356_p10 = scmp.ne.s32.totalorder %s2899_s0, %s2355_s25  ;;  %p2359_p11 = scmp.lt.u32.totalorder %s2355_s25, %s2899_s0 }
  0x39   :  { %p2361_p12 = pnand %p2359_p11, %p2356_p10 }
  0x3b   :  { %2364 = shalt.err (!%p2361_p12)
}
  0x3c   :  { %s2365_s28 = scalar_lea.vmem %s2574_s12, 256  ;;  %p2370_p0 = scmp.lt.s32.totalorder %s2574_s12, %s2574_s12 }
  0x3d   :  { %p2366_p13 = scmp.ne.s32.totalorder %s2574_s12, %s2365_s28  ;;  %p2371_p1 = scmp.lt.s32.totalorder %s2365_s28, %s2365_s28 }
  0x3f   :  { %p2372_p2 = por %p2371_p1, %p2370_p0 }
  0x41   :  { %p2373_p3 = pnand %p2372_p2, %p2366_p13 }
  0x43   :  { %2376 = shalt.err (!%p2373_p3)
}
  0x44   :  { %29 = dma.hbm_to_vmem [thread:$0]  %s2899_s0, 256, %s2574_s12, [#allocation7], %s2477_s17, %s2477_s17, %s2478_s18  }
  0x45   :  { %s2481_s10 = smov [#allocation11]   ;;  %s2482_s13 = smov [#allocation14]  }
  0x46   :  { %s47_s11 = sshll.u32 %s2481_s10, 4  ;;  %s71_s14 = sshll.u32 %s2482_s13, 4  ;;  %s48_s11 = int_to_ptr.vmem [resolvable:$true] %s47_s11  ;;  %s2611_s14 = int_to_ptr.vmem [resolvable:$true] %s71_s14 }
  0x47   :  { %s2377_s19 = scalar_lea.hbm %s2901_s2, 256 }
  0x48   :  { %p2378_p4 = scmp.ne.s32.totalorder %s2901_s2, %s2377_s19  ;;  %p2381_p5 = scmp.lt.u32.totalorder %s2377_s19, %s2901_s2 }
  0x4a   :  { %p2383_p6 = pnand %p2381_p5, %p2378_p4 }
  0x4c   :  { %2386 = shalt.err (!%p2383_p6)
}
  0x4d   :  { %s2387_s0 = scalar_lea.vmem %s48_s11, 256  ;;  %p2392_p8 = scmp.lt.s32.totalorder %s48_s11, %s48_s11 }
  0x4e   :  { %p2388_p7 = scmp.ne.s32.totalorder %s48_s11, %s2387_s0  ;;  %p2393_p9 = scmp.lt.s32.totalorder %s2387_s0, %s2387_s0 }
  0x50   :  { %p2394_p10 = por %p2393_p9, %p2392_p8 }
  0x52   :  { %p2395_p11 = pnand %p2394_p10, %p2388_p7 }
  0x54   :  { %2398 = shalt.err (!%p2395_p11)
}
  0x55   :  { %53 = dma.hbm_to_vmem [thread:$0]  %s2901_s2, 256, %s48_s11, [#allocation10], %s2477_s17, %s2477_s17, %s2478_s18  }
  0x56   :  { %s2399_s25 = scalar_lea.hbm %s2903_s4, 512 }
  0x57   :  { %p2400_p12 = scmp.ne.s32.totalorder %s2903_s4, %s2399_s25  ;;  %p2403_p13 = scmp.lt.u32.totalorder %s2399_s25, %s2903_s4 }
  0x59   :  { %p2405_p0 = pnand %p2403_p13, %p2400_p12 }
  0x5b   :  { %2408 = shalt.err (!%p2405_p0)
}
  0x5c   :  { %s2409_s28 = scalar_lea.vmem %s2611_s14, 512  ;;  %p2414_p2 = scmp.lt.s32.totalorder %s2611_s14, %s2611_s14 }
  0x5d   :  { %p2410_p1 = scmp.ne.s32.totalorder %s2611_s14, %s2409_s28  ;;  %p2415_p3 = scmp.lt.s32.totalorder %s2409_s28, %s2409_s28 }
  0x5f   :  { %p2416_p4 = por %p2415_p3, %p2414_p2 }
  0x61   :  { %p2417_p5 = pnand %p2416_p4, %p2410_p1 }
  0x63   :  { %2420 = shalt.err (!%p2417_p5)
}
  0x64   :  { %77 = dma.hbm_to_vmem [thread:$0]  %s2903_s4, 512, %s2611_s14, [#allocation13], %s2477_s17, %s2477_s17, %s2478_s18  }
  0x65   :  { %s2483_s9 = smov [#allocation17]   ;;  %s2421_s15 = scalar_lea.hbm %s2905_s6, 512 }
  0x66   :  { %s95_s10 = sshll.u32 %s2483_s9, 4  ;;  %p2422_p6 = scmp.ne.s32.totalorder %s2905_s6, %s2421_s15  ;;  %s96_s10 = int_to_ptr.vmem [resolvable:$true] %s95_s10 }
  0x67   :  { %p2425_p7 = scmp.lt.u32.totalorder %s2421_s15, %s2905_s6 }
  0x69   :  { %p2427_p8 = pnand %p2425_p7, %p2422_p6 }
  0x6b   :  { %2430 = shalt.err (!%p2427_p8)
}
  0x6c   :  { %s2431_s3 = scalar_lea.vmem %s96_s10, 512  ;;  %p2436_p10 = scmp.lt.s32.totalorder %s96_s10, %s96_s10 }
  0x6d   :  { %p2432_p9 = scmp.ne.s32.totalorder %s96_s10, %s2431_s3  ;;  %p2437_p11 = scmp.lt.s32.totalorder %s2431_s3, %s2431_s3 }
  0x6f   :  { %p2438_p12 = por %p2437_p11, %p2436_p10 }
  0x71   :  { %p2439_p13 = pnand %p2438_p12, %p2432_p9 }
  0x73   :  { %2442 = shalt.err (!%p2439_p13)
}
  0x74   :  { %101 = dma.hbm_to_vmem [thread:$0]  %s2905_s6, 512, %s96_s10, [#allocation16], %s2477_s17, %s2477_s17, %s2478_s18  }
  0x75   :  { %2465 = dma.done.wait [#allocation7], 256  }
  0x76   :  { %2466 = vsyncadd [#allocation7], 4294967040 }
  0x77   :  { %2467 = dma.done.wait [#allocation10], 512  }
  0x78   :  { %2468 = vsyncadd [#allocation10], 4294966784 }
  0x79   :  { %2469 = dma.done.wait [#allocation13], 1024  }
  0x7a   :  { %2470 = vsyncadd [#allocation13], 4294966272 }
  0x7b   :  { %2471 = dma.done.wait [#allocation16], 1024  }
  0x7c   :  { %2472 = vsyncadd [#allocation16], 4294966272  ;;  %vm140_vm0 = vcmask 261120   ;;  %v238_v1 = vld [vmem:[#allocation14] sm:$0xff]  ;;  %v239_v2 = vld [vmem:[#allocation14 + $0x8] sm:$0xff]  ;;  %v2484_v25 = vmov 0.0  }
  0x7d   :  { %vm2665_vm1 = vmpackc.low %vm140_vm0, %vm140_vm0  ;;  %v131_v3 = vld [vmem:[#allocation12] sm:$0xff]  ;;  %v2204_v4 = vpack.c.bf16 %v239_v2, %v238_v1  ;;  %v132_v5 = vld [vmem:[#allocation12 + $0x8] sm:$0xff]  ;;  %vm2485_vm2 = vmmov 0   ;;  %vm449_vm3 = vcmask 64512   ;;  %s2486_s22 = smov 120   ;;  %s2487_s25 = smov 112  }
  0x7e   :  { %v240_v6 = vld [vmem:[#allocation14 + $0x10] sm:$0xff]  ;;  %v241_v7 = vld [vmem:[#allocation14 + $0x18] sm:$0xff]  ;;  %v2192_v8 = vpack.c.bf16 %v132_v5, %v131_v3  ;;  %v127_v12 = vld [vmem:[#allocation9] sm:$0xff]  ;;  %s2488_s26 = smov 104   ;;  %s2489_s27 = smov 16   ;;  %vm786_vm4 = vcmask 130112  }
  0x7f   :  { %v2210_v9 = vpack.c.bf16 %v241_v7, %v240_v6  ;;  %v133_v10 = vld [vmem:[#allocation12 + $0x10] sm:$0xff]  ;;  %v134_v11 = vld [vmem:[#allocation12 + $0x18] sm:$0xff]  ;;  %2206 = vmatprep.subr.msk.bf16.mxu1 %vm2665_vm1, %v2204_v4  ;;  %2087 = vmatprep.mubr.msk.f32.mxu1 %vm140_vm0, %v127_v12  ;;  %v342_v15 = vld [vmem:[#allocation15] sm:$0xff]  ;;  %vm963_vm5 = vcmask 195712   ;;  %s2490_s29 = smov 24   ;;  %vm1140_vm6 = vcmask 261312  }
  0x80   :  { %v2198_v13 = vpack.c.bf16 %v134_v11, %v133_v10  ;;  %v125_v14 = vld [vmem:[#allocation6] sm:$0xff]  ;;  %2194 = vmatprep.subr.msk.bf16.mxu0 %vm2665_vm1, %v2192_v8  ;;  %2209 = vmatpush3.bf16.xpose.msk.msra.mxu1 %vm2665_vm1, %v2204_v4  ;;  %v343_v16 = vld [vmem:[#allocation15 + $0x8] sm:$0xff]  ;;  %v126_v19 = vld [vmem:[#allocation6 + $0x8] sm:$0xff]  ;;  %s2491_s2 = smov [#allocation18]  }
  0x81   :  { %2197 = vmatpush3.bf16.xpose.msk.msra.mxu0 %vm2665_vm1, %v2192_v8  ;;  %2212 = vmatprep.subr.msk.bf16.mxu1 %vm2665_vm1, %v2210_v9  ;;  %v2216_v17 = vpack.c.bf16 %v343_v16, %v342_v15  ;;  %v128_v18 = vld [vmem:[#allocation9 + $0x8] sm:$0xff]  ;;  %v344_v20 = vld [vmem:[#allocation15 + $0x10] sm:$0xff]  ;;  %v345_v21 = vld [vmem:[#allocation15 + $0x18] sm:$0xff]  ;;  %s1945_s5 = sshll.u32 %s2491_s2, 4  ;;  %s1946_s5 = int_to_ptr.vmem [resolvable:$true] %s1945_s5 }
  0x82   :  { %2200 = vmatprep.subr.msk.bf16.mxu0 %vm2665_vm1, %v2198_v13  ;;  %2076 = vmatprep.mubr.msk.f32.mxu0 %vm140_vm0, %v125_v14  ;;  %v2222_v22 = vpack.c.bf16 %v345_v21, %v344_v20  ;;  %v129_v23 = vld [vmem:[#allocation11] sm:$0xff]  ;;  %v130_v24 = vld [vmem:[#allocation11 + $0x8] sm:$0xff]  ;;  %s2443_s9 = scalar_lea.vmem %s1946_s5, 256  ;;  %p2448_p1 = scmp.lt.s32.totalorder %s1946_s5, %s1946_s5 }
  0x83   :  { %v1967_v26 = vld [vmem:[%s2906_s7 + $0x1] ss:$0 sm:$0xff]  ;;  %v1960_v27 = vld [vmem:[%s2906_s7] ss:$0 sm:$0xff]  ;;  %v1974_v42 = vld [vmem:[%s2906_s7 + $0x2] ss:$0 sm:$0xff]  ;;  %p2444_p0 = scmp.ne.s32.totalorder %s1946_s5, %s2443_s9  ;;  %p2449_p2 = scmp.lt.s32.totalorder %s2443_s9, %s2443_s9 }
  0x85   :  { %p2450_p3 = por %p2449_p2, %p2448_p1 }
  0x87   :  { %p2451_p4 = pnand %p2450_p3, %p2444_p0 }
  0x88   :  { %2215 = vmatpush3.bf16.xpose.msk.msra.mxu1 %vm2665_vm1, %v2210_v9 }
  0x89   :  { %2203 = vmatpush3.bf16.xpose.msk.msra.mxu0 %vm2665_vm1, %v2198_v13  ;;  %2101 = vmatprep.subr.mxu1 %v2484_v25 }
  0x8a   :  { %2218 = vmatprep.subr.msk.bf16.mxu0 %vm2665_vm1, %v2216_v17 }
  0x8f   :  { %2088 = vmatmul.mubr.msk.f32.vlgmr.msra.gmra.mrb[0].mxu1 %vm140_vm0, %v128_v18 }
  0x90   :  { %2077 = vmatmul.mubr.msk.f32.vlgmr.msra.gmra.mrb[0].mxu0 %vm140_vm0, %v126_v19  ;;  %2103 = vmatprep.mubr.msk.f32.mxu1 %vm2485_vm2, %v2484_v25 }
  0x91   :  { %2221 = vmatpush3.bf16.xpose.msk.msra.mxu0 %vm2665_vm1, %v2216_v17  ;;  %2098 = vmatprep.mubr.msk.f32.mxu0 %vm140_vm0, %v129_v23 }
  0x92   :  { %2224 = vmatprep.subr.msk.bf16.mxu0 %vm2665_vm1, %v2222_v22 }
  0x99   :  { %2227 = vmatpush3.bf16.xpose.msk.msra.mxu0 %vm2665_vm1, %v2222_v22 }
  0x9a   :  { %2141 = vmatprep.subr.mxu0 %v2484_v25 }
  0xa0   :  { %2099 = vmatmul.mubr.msk.f32.vlgmr.msra.gmra.mrb[2].mxu0 %vm140_vm0, %v130_v24 }
  0xa1   :  { %2143 = vmatprep.mubr.msk.f32.mxu0 %vm2485_vm2, %v2484_v25 }
 0x162   :  { %v2089_v28 = vpop.f32.mrb[0].mxu1 }
 0x163   :  { %v337_v29 = vadd.f32 %v2089_v28, %v1967_v26  ;;  %v2078_v30 = vpop.f32.mrb[0].mxu0  ;;  %v331_v31 = vpop.f32.mrb[1].mxu1 }
 0x164   :  { %v231_v32 = vadd.f32 %v2078_v30, %v1960_v27  ;;  %v332_v33 = vadd.f32 %v1967_v26, %v331_v31  ;;  %v225_v34 = vpop.f32.mrb[1].mxu0 }
 0x165   :  { %341 = vst.msk [vmem:[#allocation3 + $0x8] sm:$0xff] %vm140_vm0, %v337_v29  ;;  %v226_v35 = vadd.f32 %v1960_v27, %v225_v34 }
 0x166   :  { %v235_v36 = vmul.f32 0.35355338, %v231_v32  ;;  %340 = vst.msk [vmem:[#allocation3] sm:$0xff] %vm140_vm0, %v332_v33 }
 0x167   :  { %v234_v37 = vmul.f32 0.35355338, %v226_v35 }
 0x168   :  { %237 = vst.msk [vmem:[#allocation2 + $0x8] sm:$0xff] %vm140_vm0, %v235_v36 }
 0x169   :  { %236 = vst.msk [vmem:[#allocation2] sm:$0xff] %vm140_vm0, %v234_v37 }
 0x16c   :  { %v2715_v38 = vld [vmem:[#allocation3 + $0x8] sm:$0xff] }
 0x16d   :  { %2142 = vmatpush3.xpose.msk.msra.mxu0 %vm449_vm3, %v2715_v38  ;;  %v447_v39 = vld [vmem:[#allocation3] sm:$0xff] }
 0x16e   :  { %2102 = vmatpush3.xpose.msk.msra.mxu1 %vm449_vm3, %v447_v39  ;;  %2151 = vmatprep.subr.mxu0 %v2484_v25 }
 0x16f   :  { %v2721_v40 = vld [vmem:[#allocation2 + $0x8] sm:$0xff]  ;;  %2106 = vmatprep.subr.mxu1 %v2484_v25 }
 0x170   :  { %2144 = vmatmul.mubr.msk.f32.vlgmr.msra.gmra.mrb[4].mxu0 %vm449_vm3, %v2721_v40  ;;  %v611_v41 = vld [vmem:[#allocation2] sm:$0xff] }
 0x171   :  { %615 = vrot.lane.b32.xlu1 %v611_v41, %s2486_s22  ;;  %2104 = vmatmul.mubr.msk.f32.vlgmr.msra.gmra.mrb[2].mxu1 %vm449_vm3, %v611_v41 }
 0x172   :  { %2108 = vmatprep.mubr.msk.f32.mxu1 %vm2485_vm2, %v2484_v25  ;;  %2153 = vmatprep.mubr.msk.f32.mxu0 %vm2485_vm2, %v2484_v25 }
 0x173   :  { %v2100_v43 = vpop.f32.mrb[2].mxu0 }
 0x174   :  { %v441_v44 = vadd.f32 %v2100_v43, %v1974_v42  ;;  %v435_v45 = vpop.f32.mrb[3].mxu0 }
 0x175   :  { %v436_v46 = vadd.f32 %v1974_v42, %v435_v45 }
 0x176   :  { %445 = vst.msk [vmem:[#allocation4 + $0x8] sm:$0xff] %vm140_vm0, %v441_v44 }
 0x177   :  { %444 = vst.msk [vmem:[#allocation4] sm:$0xff] %vm140_vm0, %v436_v46 }
 0x17d   :  { %v1660_v42 = vld [vmem:[#allocation4 + $0x8] sm:$0xff] }
 0x17e   :  { %v2737_v47 = vld [vmem:[#allocation4] sm:$0xff] }
 0x17f   :  { %2107 = vmatpush3.msra.mxu1 %v2737_v47 }
 0x180   :  { %2111 = vmatprep.subr.mxu1 %v2484_v25 }
 0x1e3   :  { %v616_v58 = vpop.permute.xlu1 %615 }
 0x243   :  { %v2741_v48 = vpop.f32.mrb[4].mxu0 }
 0x244   :  { %v522_v49 = vpop.f32.mrb[2].mxu1  ;;  %v2145_v50 = vpop.f32.mrb[5].mxu0  ;;  %v1221_v17 = vsel %vm449_vm3, %v2741_v48, -inf }
 0x245   :  { %v2105_v51 = vpop.f32.mrb[3].mxu1  ;;  %v526_v52 = vsel %vm449_vm3, %v522_v49, -inf }
 0x246   :  { %527 = vmax.xlane.f32.xlu0 %v526_v52 }
 0x25c   :  { %618 = vrot.lane.b32.xlu0 %v447_v39, %s2486_s22 }
 0x260   :  { %704 = vrot.lane.b32.xlu0 %v2737_v47, %s2486_s22 }
 0x264   :  { %795 = vrot.lane.b32.xlu0 %v447_v39, %s2487_s25 }
 0x268   :  { %792 = vrot.lane.b32.xlu0 %v611_v41, %s2487_s25 }
 0x2d3   :  { %v528_v53 = vpop.xlane.xlu0 %527 }
 0x2d4   :  { %v529_v54 = vsub.f32 %v522_v49, %v528_v53 }
 0x2d6   :  { %v530_v55 = vmul.f32 1.442695, %v529_v54 }
 0x2d7   :  { %v619_v56 = vpop.permute.xlu0 %618 }
 0x2d8   :  { %2257 = vpow2.f32 %v530_v55 }
 0x2db   :  { %v705_v59 = vpop.permute.xlu0 %704 }
 0x2df   :  { %v796_v8 = vpop.permute.xlu0 %795 }
 0x2e2   :  { %v2749_v57 = vpop.eup %2257 }
 0x2e3   :  { %2109 = vmatmul.mubr.msk.f32.vlgmr.msra.gmra.mrb[4].mxu1 %vm449_vm3, %v2749_v57  ;;  %v793_v11 = vpop.permute.xlu0 %792 }
 0x2e4   :  { %2112 = vmatpush3.xpose.msk.msra.mxu1 %vm449_vm3, %v619_v56  ;;  %2113 = vmatprep.mubr.msk.f32.mxu1 %vm2485_vm2, %v2484_v25 }
 0x2e5   :  { %2116 = vmatprep.subr.mxu1 %v2484_v25 }
 0x2e7   :  { %2114 = vmatmul.mubr.msk.f32.vlgmr.msra.gmra.mrb[6].mxu1 %vm449_vm3, %v616_v58 }
 0x2e8   :  { %2117 = vmatpush3.msra.mxu1 %v705_v59  ;;  %2118 = vmatprep.mubr.msk.f32.mxu1 %vm2485_vm2, %v2484_v25 }
 0x2e9   :  { %2121 = vmatprep.subr.mxu1 %v2484_v25 }
 0x3b6   :  { %v2761_v60 = vpop.f32.mrb[4].mxu1 }
 0x3b7   :  { %v2110_v61 = vpop.f32.mrb[5].mxu1 }
 0x3ba   :  { %v690_v62 = vpop.f32.mrb[6].mxu1 }
 0x3bb   :  { %v2115_v63 = vpop.f32.mrb[7].mxu1  ;;  %v694_v1 = vsel %vm449_vm3, %v690_v62, -inf }
 0x3bc   :  { %695 = vmax.xlane.f32.xlu1 %v694_v1 }
 0x3cd   :  { %881 = vrot.lane.b32.xlu1 %v2737_v47, %s2487_s25 }
 0x3d1   :  { %972 = vrot.lane.b32.xlu1 %v447_v39, %s2488_s26 }
 0x3d5   :  { %969 = vrot.lane.b32.xlu1 %v611_v41, %s2488_s26 }
 0x3d9   :  { %1313 = vrot.lane.b32.xlu1 %v2715_v38, %s2486_s22 }
 0x3dd   :  { %1489 = vrot.lane.b32.xlu1 %v2715_v38, %s2487_s25 }
 0x3e1   :  { %1486 = vrot.lane.b32.xlu1 %v2721_v40, %s2487_s25 }
 0x3e5   :  { %1665 = vrot.lane.b32.xlu1 %v2715_v38, %s2488_s26 }
 0x3e9   :  { %1662 = vrot.lane.b32.xlu1 %v2721_v40, %s2488_s26 }
 0x449   :  { %v696_v2 = vpop.xlane.xlu1 %695 }
 0x44a   :  { %v697_v3 = vsub.f32 %v690_v62, %v696_v2 }
 0x44c   :  { %v698_v4 = vmul.f32 1.442695, %v697_v3 }
 0x44d   :  { %v882_v5 = vpop.permute.xlu1 %881 }
 0x44e   :  { %2259 = vpow2.f32 %v698_v4 }
 0x451   :  { %v973_v6 = vpop.permute.xlu1 %972 }
 0x455   :  { %v970_v7 = vpop.permute.xlu1 %969 }
 0x458   :  { %v2778_v9 = vpop.eup %2259 }
 0x459   :  { %2119 = vmatmul.mubr.msk.f32.vlgmr.msra.gmra.mrb[8].mxu1 %vm449_vm3, %v2778_v9  ;;  %v1314_v10 = vpop.permute.xlu1 %1313  ;;  %v700_v44 = vsel %vm449_vm3, %v2778_v9, 0.0 }
 0x45a   :  { %2122 = vmatpush3.xpose.msk.msra.mxu1 %vm449_vm3, %v796_v8  ;;  %2152 = vmatpush3.xpose.msk.msra.mxu0 %vm449_vm3, %v1314_v10 }
 0x45b   :  { %2123 = vmatprep.mubr.msk.f32.mxu1 %vm2485_vm2, %v2484_v25  ;;  %2126 = vmatprep.subr.mxu1 %v2484_v25 }
 0x45c   :  { %2161 = vmatprep.subr.mxu0 %v2484_v25 }
 0x45d   :  { %2124 = vmatmul.mubr.msk.f32.vlgmr.msra.gmra.mrb[10].mxu1 %vm449_vm3, %v793_v11  ;;  %v1490_v18 = vpop.permute.xlu1 %1489 }
 0x45e   :  { %2127 = vmatpush3.msra.mxu1 %v882_v5  ;;  %2128 = vmatprep.mubr.msk.f32.mxu1 %vm2485_vm2, %v2484_v25  ;;  %v532_v5 = vsel %vm449_vm3, %v2749_v57, 0.0 }
 0x45f   :  { %2131 = vmatprep.subr.mxu1 %v2484_v25 }
 0x461   :  { %v1487_v19 = vpop.permute.xlu1 %1486 }
 0x465   :  { %v1666_v24 = vpop.permute.xlu1 %1665 }
 0x469   :  { %v1663_v26 = vpop.permute.xlu1 %1662 }
 0x52c   :  { %v2792_v12 = vpop.f32.mrb[8].mxu1 }
 0x52d   :  { %v2120_v13 = vpop.f32.mrb[9].mxu1 }
 0x530   :  { %v867_v14 = vpop.f32.mrb[10].mxu1 }
 0x531   :  { %v2125_v15 = vpop.f32.mrb[11].mxu1  ;;  %v871_v16 = vsel %vm449_vm3, %v867_v14, -inf }
 0x532   :  { %872 = vmax.xlane.f32.xlu0 %v871_v16 }
 0x548   :  { %1310 = vrot.lane.b32.xlu0 %v2721_v40, %s2486_s22 }
 0x567   :  { %1222 = vmax.xlane.f32.xlu0 %v1221_v17 }
 0x5bf   :  { %v873_v20 = vpop.xlane.xlu0 %872 }
 0x5c0   :  { %v874_v21 = vsub.f32 %v867_v14, %v873_v20 }
 0x5c2   :  { %v875_v22 = vmul.f32 1.442695, %v874_v21 }
 0x5c3   :  { %v1311_v23 = vpop.permute.xlu0 %1310 }
 0x5c4   :  { %2261 = vpow2.f32 %v875_v22  ;;  %2154 = vmatmul.mubr.msk.f32.vlgmr.msra.gmra.mrb[6].mxu0 %vm449_vm3, %v1311_v23 }
 0x5c5   :  { %2162 = vmatpush3.xpose.msk.msra.mxu0 %vm449_vm3, %v1490_v18  ;;  %2163 = vmatprep.mubr.msk.f32.mxu0 %vm2485_vm2, %v2484_v25 }
 0x5c6   :  { %2171 = vmatprep.subr.mxu0 %v2484_v25 }
 0x5c8   :  { %2164 = vmatmul.mubr.msk.f32.vlgmr.msra.gmra.mrb[8].mxu0 %vm449_vm3, %v1487_v19 }
 0x5c9   :  { %2172 = vmatpush3.xpose.msk.msra.mxu0 %vm449_vm3, %v1666_v24  ;;  %2173 = vmatprep.mubr.msk.f32.mxu0 %vm2485_vm2, %v2484_v25 }
 0x5cc   :  { %2174 = vmatmul.mubr.msk.f32.vlgmr.msra.gmra.mrb[10].mxu0 %vm449_vm3, %v1663_v26 }
 0x5ce   :  { %v2262_v27 = vpop.eup %2261 }
 0x5cf   :  { %2129 = vmatmul.mubr.msk.f32.vlgmr.msra.gmra.mrb[12].mxu1 %vm449_vm3, %v2262_v27  ;;  %v877_v43 = vsel %vm449_vm3, %v2262_v27, 0.0 }
 0x5d0   :  { %2132 = vmatpush3.xpose.msk.msra.mxu1 %vm449_vm3, %v973_v6  ;;  %2133 = vmatprep.mubr.msk.f32.mxu1 %vm2485_vm2, %v2484_v25 }
 0x5d1   :  { %2136 = vmatprep.subr.mxu1 %v2484_v25 }
 0x5d3   :  { %2134 = vmatmul.mubr.msk.f32.vlgmr.msra.gmra.mrb[14].mxu1 %vm449_vm3, %v970_v7 }
 0x5d4   :  { %2138 = vmatprep.mubr.msk.f32.mxu1 %vm2485_vm2, %v2484_v25 }
 0x5f4   :  { %v1223_v45 = vpop.xlane.xlu0 %1222 }
 0x5f5   :  { %v1224_v59 = vsub.f32 %v2741_v48, %v1223_v45 }
 0x5f7   :  { %v1225_v3 = vmul.f32 1.442695, %v1224_v59 }
 0x697   :  { %v1385_v28 = vpop.f32.mrb[6].mxu0 }
 0x698   :  { %v2155_v29 = vpop.f32.mrb[7].mxu0  ;;  %v1389_v30 = vsel %vm449_vm3, %v1385_v28, -inf }
 0x699   :  { %1390 = vmax.xlane.f32.xlu1 %v1389_v30  ;;  %v1837_v30 = vld [vmem:[#allocation17 + $0x8] sm:$0xff] }
 0x69b   :  { %v1561_v31 = vpop.f32.mrb[8].mxu0 }
 0x69c   :  { %v2165_v32 = vpop.f32.mrb[9].mxu0  ;;  %v1565_v33 = vsel %vm449_vm3, %v1561_v31, -inf }
 0x69d   :  { %1566 = vmax.xlane.f32.xlu0 %v1565_v33 }
 0x69f   :  { %v1737_v34 = vpop.f32.mrb[10].mxu0 }
 0x6a0   :  { %v2175_v35 = vpop.f32.mrb[11].mxu0  ;;  %v1741_v36 = vsel %vm449_vm3, %v1737_v34, -inf }
 0x6a1   :  { %1742 = vmax.xlane.f32.xlu1 %v1741_v36 }
 0x6a2   :  { %v2820_v37 = vpop.f32.mrb[12].mxu1 }
 0x6a3   :  { %v2130_v38 = vpop.f32.mrb[13].mxu1 }
 0x6a4   :  { %v1839_v38 = vld [vmem:[#allocation17 + $0x18] sm:$0xff] }
 0x6a6   :  { %v1044_v39 = vpop.f32.mrb[14].mxu1 }
 0x6a7   :  { %v2135_v40 = vpop.f32.mrb[15].mxu1  ;;  %v1048_v41 = vsel %vm449_vm3, %v1044_v39, -inf }
 0x6a8   :  { %1049 = vmax.xlane.f32.xlu1 %v1048_v41 }
 0x6b3   :  { %1058 = vrot.lane.b32.xlu0 %v2737_v47, %s2488_s26 }
 0x6b7   :  { %1751 = vrot.lane.b32.xlu0 %v1660_v42, %s2488_s26 }
 0x6b9   :  { %1399 = vrot.lane.b32.xlu1 %v1660_v42, %s2486_s22 }
 0x6bd   :  { %1575 = vrot.lane.b32.xlu1 %v1660_v42, %s2487_s25 }
 0x6d6   :  { %878 = vadd.xlane.f32.xlu0 %v877_v43 }
 0x6e1   :  { %701 = vadd.xlane.f32.xlu1 %v700_v44 }
 0x726   :  { %v1391_v46 = vpop.xlane.xlu1 %1390 }
 0x727   :  { %v1392_v49 = vsub.f32 %v1385_v28, %v1391_v46 }
 0x729   :  { %v1393_v50 = vmul.f32 1.442695, %v1392_v49 }
 0x72a   :  { %v1567_v51 = vpop.xlane.xlu0 %1566 }
 0x72b   :  { %2263 = vpow2.f32 %v1393_v50  ;;  %v1568_v47 = vsub.f32 %v1561_v31, %v1567_v51 }
 0x72d   :  { %v1569_v52 = vmul.f32 1.442695, %v1568_v47 }
 0x72e   :  { %v1059_v53 = vpop.permute.xlu0 %1058  ;;  %v1743_v54 = vpop.xlane.xlu1 %1742 }
 0x72f   :  { %2265 = vpow2.f32 %v1569_v52  ;;  %2137 = vmatpush3.msra.mxu1 %v1059_v53  ;;  %v1744_v55 = vsub.f32 %v1737_v34, %v1743_v54 }
 0x730   :  { %2146 = vmatprep.subr.mxu1 %v2484_v25 }
 0x731   :  { %v1745_v63 = vmul.f32 1.442695, %v1744_v55 }
 0x732   :  { %v1752_v13 = vpop.permute.xlu0 %1751 }
 0x735   :  { %v2264_v56 = vpop.eup %2263  ;;  %v1050_v58 = vpop.xlane.xlu1 %1049 }
 0x736   :  { %v1051_v61 = vsub.f32 %v1044_v39, %v1050_v58  ;;  %v1395_v62 = vsel %vm449_vm3, %v2264_v56, 0.0 }
 0x737   :  { %1396 = vadd.xlane.f32.xlu0 %v1395_v62  ;;  %v2005_v62 = vld [vmem:[%s2906_s7 + $0x3] ss:$0 sm:$0xff] }
 0x738   :  { %v1052_v1 = vmul.f32 1.442695, %v1051_v61 }
 0x739   :  { %v2266_v2 = vpop.eup %2265  ;;  %v1400_v8 = vpop.permute.xlu1 %1399 }
 0x73a   :  { %2267 = vpow2.f32 %v1052_v1  ;;  %v1571_v4 = vsel %vm449_vm3, %v2266_v2, 0.0 }
 0x73b   :  { %1572 = vadd.xlane.f32.xlu0 %v1571_v4  ;;  %2269 = vpow2.f32 %v1745_v63 }
 0x73c   :  { %2271 = vpow2.f32 %v1225_v3 }
 0x73d   :  { %v1576_v10 = vpop.permute.xlu1 %1575 }
 0x73f   :  { %533 = vadd.xlane.f32.xlu0 %v532_v5 }
 0x744   :  { %v2268_v6 = vpop.eup %2267 }
 0x745   :  { %2139 = vmatmul.mubr.msk.f32.vlgmr.msra.gmra.mrb[16].mxu1 %vm449_vm3, %v2268_v6  ;;  %v1054_v48 = vsel %vm449_vm3, %v2268_v6, 0.0  ;;  %v2270_v7 = vpop.eup %2269 }
 0x746   :  { %2147 = vmatpush3.msra.mxu1 %v1660_v42  ;;  %1055 = vadd.xlane.f32.xlu1 %v1054_v48  ;;  %v2272_v9 = vpop.eup %2271  ;;  %v1747_v57 = vsel %vm449_vm3, %v2270_v7, 0.0 }
 0x747   :  { %2148 = vmatprep.mubr.msk.f32.mxu1 %vm2485_vm2, %v2484_v25  ;;  %2156 = vmatprep.subr.mxu1 %v2484_v25  ;;  %v1227_v11 = vsel %vm449_vm3, %v2272_v9, 0.0 }
 0x749   :  { %2149 = vmatmul.mubr.msk.f32.vlgmr.msra.gmra.mrb[18].mxu1 %vm449_vm3, %v2272_v9 }
 0x74a   :  { %2157 = vmatpush3.msra.mxu1 %v1400_v8  ;;  %1748 = vadd.xlane.f32.xlu1 %v1747_v57 }
 0x74b   :  { %2158 = vmatprep.mubr.msk.f32.mxu1 %vm2485_vm2, %v2484_v25  ;;  %2166 = vmatprep.subr.mxu1 %v2484_v25 }
 0x74d   :  { %2159 = vmatmul.mubr.msk.f32.vlgmr.msra.gmra.mrb[20].mxu1 %vm449_vm3, %v2264_v56 }
 0x74e   :  { %2167 = vmatpush3.msra.mxu1 %v1576_v10  ;;  %1228 = vadd.xlane.f32.xlu1 %v1227_v11 }
 0x74f   :  { %2168 = vmatprep.mubr.msk.f32.mxu1 %vm2485_vm2, %v2484_v25  ;;  %2176 = vmatprep.subr.mxu1 %v2484_v25 }
 0x751   :  { %2169 = vmatmul.mubr.msk.f32.vlgmr.msra.gmra.mrb[22].mxu1 %vm449_vm3, %v2266_v2 }
 0x752   :  { %2177 = vmatpush3.msra.mxu1 %v1752_v13  ;;  %2178 = vmatprep.mubr.msk.f32.mxu1 %vm2485_vm2, %v2484_v25 }
 0x755   :  { %2179 = vmatmul.mubr.msk.f32.vlgmr.msra.gmra.mrb[24].mxu1 %vm449_vm3, %v2270_v7 }
 0x763   :  { %v879_v14 = vpop.xlane.xlu0 %878 }
 0x764   :  { %2273 = vrcp.f32 %v879_v14 }
 0x76e   :  { %v2274_v15 = vpop.eup %2273  ;;  %v702_v16 = vpop.xlane.xlu1 %701 }
 0x76f   :  { %2275 = vrcp.f32 %v702_v16  ;;  %v958_v17 = vmul.f32 %v2274_v15, %v2820_v37  ;;  %v1838_v37 = vld [vmem:[#allocation17 + $0x10] sm:$0xff] }
 0x770   :  { %v2234_v41 = vpack.c.bf16 %v1839_v38, %v1838_v37 }
 0x771   :  { %960 = vrot.lane.b32.xlu1 %v958_v17, %s2489_s27 }
 0x779   :  { %v2276_v18 = vpop.eup %2275 }
 0x77a   :  { %v781_v19 = vmul.f32 %v2276_v18, %v2792_v12  ;;  %v1836_v12 = vld [vmem:[#allocation17] sm:$0xff] }
 0x77b   :  { %v2228_v31 = vpack.c.bf16 %v1837_v30, %v1836_v12 }
 0x77c   :  { %783 = vrot.lane.b32.xlu0 %v781_v19, %s2478_s18 }
 0x77d   :  { %2230 = vmatprep.subr.msk.bf16.mxu0 %vm2665_vm1, %v2228_v31 }
 0x77e   :  { %2233 = vmatpush3.bf16.xpose.msk.msra.mxu0 %vm2665_vm1, %v2228_v31 }
 0x77f   :  { %2236 = vmatprep.subr.msk.bf16.mxu0 %vm2665_vm1, %v2234_v41 }
 0x786   :  { %2239 = vmatpush3.bf16.xpose.msk.msra.mxu0 %vm2665_vm1, %v2234_v41 }
 0x7c4   :  { %v1397_v20 = vpop.xlane.xlu0 %1396 }
 0x7c8   :  { %v1573_v21 = vpop.xlane.xlu0 %1572 }
 0x7cc   :  { %v534_v25 = vpop.xlane.xlu0 %533 }
 0x7cd   :  { %2277 = vrcp.f32 %v534_v25 }
 0x7d3   :  { %v1056_v24 = vpop.xlane.xlu1 %1055 }
 0x7d4   :  { %2279 = vrcp.f32 %v1056_v24 }
 0x7d7   :  { %v2278_v22 = vpop.eup %2277  ;;  %v1749_v26 = vpop.xlane.xlu1 %1748 }
 0x7d8   :  { %v609_v23 = vmul.f32 %v2278_v22, %v2761_v60 }
 0x7da   :  { %610 = vst.msk [vmem:[#allocation5] sm:$0xff] %vm449_vm3, %v609_v23 }
 0x7db   :  { %v1229_v27 = vpop.xlane.xlu1 %1228 }
 0x7dc   :  { %2281 = vrcp.f32 %v1229_v27 }
 0x7dd   :  { %2283 = vrcp.f32 %v1397_v20 }
 0x7de   :  { %v2280_v60 = vpop.eup %2279  ;;  %2285 = vrcp.f32 %v1573_v21 }
 0x7df   :  { %2287 = vrcp.f32 %v1749_v26 }
 0x7e3   :  { %v961_v29 = vpop.permute.xlu1 %960 }
 0x7e6   :  { %v2282_v35 = vpop.eup %2281 }
 0x7e7   :  { %v2284_v42 = vpop.eup %2283 }
 0x7e8   :  { %v2286_v46 = vpop.eup %2285 }
 0x7e9   :  { %v2288_v47 = vpop.eup %2287 }
 0x7ee   :  { %v784_v28 = vpop.permute.xlu0 %783 }
 0x7ef   :  { %787 = vst.msk [vmem:[#allocation5] sm:$0xff] %vm786_vm4, %v784_v28 }
 0x7f0   :  { %964 = vst.msk [vmem:[#allocation5] sm:$0xff] %vm963_vm5, %v961_v29 }
 0x818   :  { %v1130_v32 = vpop.f32.mrb[16].mxu1 }
 0x819   :  { %v1135_v33 = vmul.f32 %v2280_v60, %v1130_v32  ;;  %v2140_v34 = vpop.f32.mrb[17].mxu1 }
 0x81b   :  { %1137 = vrot.lane.b32.xlu0 %v1135_v33, %s2490_s29 }
 0x81c   :  { %v1299_v36 = vpop.f32.mrb[18].mxu1 }
 0x81d   :  { %v1304_v39 = vmul.f32 %v2282_v35, %v1299_v36  ;;  %v2150_v40 = vpop.f32.mrb[19].mxu1 }
 0x81f   :  { %1305 = vst.msk [vmem:[#allocation5 + $0x8] sm:$0xff] %vm449_vm3, %v1304_v39 }
 0x820   :  { %v1471_v43 = vpop.f32.mrb[20].mxu1 }
 0x821   :  { %v1476_v44 = vmul.f32 %v2284_v42, %v1471_v43  ;;  %v2160_v45 = vpop.f32.mrb[21].mxu1 }
 0x823   :  { %1478 = vrot.lane.b32.xlu1 %v1476_v44, %s2478_s18 }
 0x824   :  { %v1647_v49 = vpop.f32.mrb[22].mxu1 }
 0x825   :  { %v1652_v50 = vmul.f32 %v2286_v46, %v1647_v49  ;;  %v2170_v51 = vpop.f32.mrb[23].mxu1 }
 0x827   :  { %1654 = vrot.lane.b32.xlu1 %v1652_v50, %s2489_s27 }
 0x828   :  { %v1823_v52 = vpop.f32.mrb[24].mxu1 }
 0x829   :  { %v1828_v53 = vmul.f32 %v2288_v47, %v1823_v52  ;;  %v2180_v54 = vpop.f32.mrb[25].mxu1 }
 0x82b   :  { %1830 = vrot.lane.b32.xlu0 %v1828_v53, %s2490_s29 }
 0x88d   :  { %v1138_v55 = vpop.permute.xlu0 %1137 }
 0x88e   :  { %1141 = vst.msk [vmem:[#allocation5] sm:$0xff] %vm1140_vm6, %v1138_v55 }
 0x895   :  { %v1479_v0 = vpop.permute.xlu1 %1478  ;;  %v1834_v56 = vld [vmem:[#allocation5] sm:$0xff] }
 0x896   :  { %1481 = vst.msk [vmem:[#allocation5 + $0x8] sm:$0xff] %vm786_vm4, %v1479_v0  ;;  %2189 = vmatprep.mubr.msk.f32.mxu0 %vm140_vm0, %v1834_v56 }
 0x899   :  { %v1655_v58 = vpop.permute.xlu1 %1654 }
 0x89a   :  { %1657 = vst.msk [vmem:[#allocation5 + $0x8] sm:$0xff] %vm963_vm5, %v1655_v58 }
 0x89d   :  { %v1831_v59 = vpop.permute.xlu0 %1830 }
 0x89e   :  { %1833 = vst.msk [vmem:[#allocation5 + $0x8] sm:$0xff] %vm1140_vm6, %v1831_v59 }
 0x8a5   :  { %v1835_v61 = vld [vmem:[#allocation5 + $0x8] sm:$0xff] }
 0x8a6   :  { %2190 = vmatmul.mubr.msk.f32.vlgmr.msra.gmra.mrb[12].mxu0 %vm140_vm0, %v1835_v61 }
 0x979   :  { %v2191_v63 = vpop.f32.mrb[12].mxu0 }
 0x97a   :  { %v1935_v1 = vadd.f32 %v2191_v63, %v2005_v62  ;;  %v1929_v2 = vpop.f32.mrb[13].mxu0 }
 0x97b   :  { %v1930_v3 = vadd.f32 %v2005_v62, %v1929_v2 }
 0x97c   :  { %1939 = vst.msk [vmem:[#allocation18 + $0x8] sm:$0xff] %vm140_vm0, %v1935_v1 }
 0x97d   :  { %1938 = vst.msk [vmem:[#allocation18] sm:$0xff] %vm140_vm0, %v1930_v3 }
 0x97e   :  { %2454 = shalt.err (!%p2451_p4)
}
 0x97f   :  { %s2455_s11 = scalar_lea.hbm %s2907_s8, 256 }
 0x980   :  { %p2456_p5 = scmp.ne.s32.totalorder %s2907_s8, %s2455_s11  ;;  %p2459_p6 = scmp.lt.u32.totalorder %s2455_s11, %s2907_s8 }
 0x982   :  { %p2461_p7 = pnand %p2459_p6, %p2456_p5 }
 0x984   :  { %2464 = shalt.err (!%p2461_p7)
}
 0x985   :  { %1951 = dma.vmem_to_hbm [thread:$0]  %s1946_s5, 256, %s2907_s8, [#allocation8], %s2477_s17, %s2477_s17, %s2478_s18  }
 0x986   :  { %2473 = dma.done.wait [#allocation8], 256  }
 0x987   :  { %2474 = vsyncadd [#allocation8], 4294967040 }
 0x988   :  { %1955 = vsyncpa [#allocation7], 1 }
 0x989   :  { %1956 = vsyncpa [#allocation10], 1 }
 0x98a   :  { %1957 = vsyncpa [#allocation13], 1 }
 0x98b   :  { %1958 = vsyncpa [#allocation16], 1 }
 0x98c   :  { %1959 = vsyncpa [#allocation8], 1 }

</bundles_post_ra>
